<compile_context>
chip_gen: v6e
topology: v6e:2x2x1
jax: 0.10.0
libtpu: 0.0.40
codegen_flags: <defaults>
</compile_context>

<pallas_src>
import jax
import jax.numpy as jnp
from jax.experimental import pallas as pl
from jax.experimental.pallas import tpu as pltpu

EMBEDDING_DIM = 128
FEAT = 512          # facenet output features
H1, H2 = 512, 256   # hidden sizes of the `additional` head
EPS_BN = 1e-5
EPS_NORM = 1e-12


def _round_up(x, m):
    return (x + m - 1) // m * m


# ---------------------------------------------------------------------------
# Kernel
# ---------------------------------------------------------------------------
def _siamese_head_kernel(x_ref,
                         w0_ref, b0_ref,
                         w1_ref, b1_ref,
                         w2_ref, b2_ref,
                         w3_ref, b3_ref,
                         o_ref, acc_ref):
    """Fused Siamese head. Grid = (batch_tiles, k_blocks).

    The backbone projection (flatten -> 512) is K-blocked and accumulated in
    an f32 VMEM scratch; the small MLP head + L2 normalize run once per batch
    tile on the last K step.
    """
    k = pl.program_id(1)

    @pl.when(k == 0)
    def _():
        acc_ref[...] = jnp.zeros_like(acc_ref)

    # TODO(synk): full InceptionResnetV1 backbone not translated; approximated
    # by a single linear projection flatten(NCHW) -> 512, streamed over K.
    acc_ref[...] += jnp.dot(x_ref[...], w0_ref[...],
                            preferred_element_type=jnp.float32)

    @pl.when(k == pl.num_programs(1) - 1)
    def _():
        h = acc_ref[...] + b0_ref[...]                      # f32 elementwise

        # additional: Linear(512,512)+BN(folded)+ReLU (+Dropout=identity, eval)
        h = jnp.dot(h.astype(jnp.bfloat16), w1_ref[...],
                    preferred_element_type=jnp.float32) + b1_ref[...]
        h = jnp.maximum(h, 0.0)

        # additional: Linear(512,256)+BN(folded)+ReLU (+Dropout=identity, eval)
        h = jnp.dot(h.astype(jnp.bfloat16), w2_ref[...],
                    preferred_element_type=jnp.float32) + b2_ref[...]
        h = jnp.maximum(h, 0.0)

        # additional: Linear(256,128)+BN(folded)
        h = jnp.dot(h.astype(jnp.bfloat16), w3_ref[...],
                    preferred_element_type=jnp.float32) + b3_ref[...]

        # F.normalize(x, p=2, dim=1): clamp ||h|| at 1e-12 -> clamp sumsq at 1e-24
        sumsq = jnp.sum(h * h, axis=1, keepdims=True)
        inv = jax.lax.rsqrt(jnp.maximum(sumsq, EPS_NORM * EPS_NORM))
        o_ref[...] = (h * inv).astype(o_ref.dtype)


# ---------------------------------------------------------------------------
# Wrapper
# ---------------------------------------------------------------------------
def _forward_batch(x_flat, params):
    """x_flat: [M, d_in] float -> [M, EMBEDDING_DIM] L2-normalized (f32)."""
    M, d_in = x_flat.shape

    # K tiling of the backbone projection (w0 streamed over this axis).
    TK = 512
    d_pad = _round_up(d_in, TK)

    # Batch tile: sublane/bf16-friendly (multiple of 16), capped at 128.
    TB = min(128, _round_up(max(M, 1), 16))
    m_pad = _round_up(M, TB)

    x = jnp.pad(x_flat.astype(jnp.float32),
                ((0, m_pad - M), (0, d_pad - d_in))).astype(jnp.bfloat16)

    (w0, b0), (w1, b1), (w2, b2), (w3, b3) = params
    w0 = jnp.pad(w0.astype(jnp.float32),
                 ((0, d_pad - d_in), (0, 0))).astype(jnp.bfloat16)
    w1 = w1.astype(jnp.bfloat16)
    w2 = w2.astype(jnp.bfloat16)
    w3 = w3.astype(jnp.bfloat16)
    b0, b1, b2, b3 = (b.astype(jnp.float32).reshape(1, -1)
                      for b in (b0, b1, b2, b3))

    grid = (m_pad // TB, d_pad // TK)
    const = lambda i, k: (0, 0)

    in_specs = [
        pl.BlockSpec((TB, TK), lambda i, k: (i, k)),        # x: batch x K tile
        pl.BlockSpec((TK, FEAT), lambda i, k: (k, 0)),      # w0 streamed over K
        pl.BlockSpec((1, FEAT), const),                     # b0 (resident)
        pl.BlockSpec((FEAT, H1), const),                    # w1 (resident)
        pl.BlockSpec((1, H1), const),
        pl.BlockSpec((H1, H2), const),                      # w2 (resident)
        pl.BlockSpec((1, H2), const),
        pl.BlockSpec((H2, EMBEDDING_DIM), const),           # w3 (resident)
        pl.BlockSpec((1, EMBEDDING_DIM), const),
    ]
    out_spec = pl.BlockSpec((TB, EMBEDDING_DIM), lambda i, k: (i, 0))

    # VMEM footprint: resident bf16 head weights + f32 biases (single-buffered,
    # constant index maps), double-buffered x / w0 / out tiles, f32 accumulator.
    resident = 2 * (FEAT * H1 + H1 * H2 + H2 * EMBEDDING_DIM) \
        + 4 * (FEAT + H1 + H2 + EMBEDDING_DIM)
    pipelined = 2 * (TB * TK * 2 + TK * FEAT * 2 + TB * EMBEDDING_DIM * 4)
    scratch = TB * FEAT * 4
    footprint = int(1.5 * (resident + pipelined + scratch)) + (4 << 20)
    vmem_bytes = min(max(footprint, 32 << 20), 48 << 20)   # never 64 MiB (v7x cap)

    flops = 2 * m_pad * (d_pad * FEAT + FEAT * H1 + H1 * H2 + H2 * EMBEDDING_DIM)
    bytes_accessed = (x.size * 2 + w0.size * 2 + w1.size * 2 + w2.size * 2
                      + w3.size * 2
                      + 4 * (b0.size + b1.size + b2.size + b3.size)
                      + m_pad * EMBEDDING_DIM * 4)

    out = pl.pallas_call(
        _siamese_head_kernel,
        out_shape=jax.ShapeDtypeStruct((m_pad, EMBEDDING_DIM), jnp.float32),
        grid_spec=pltpu.PrefetchScalarGridSpec(
            num_scalar_prefetch=0,
            grid=grid,
            in_specs=in_specs,
            out_specs=out_spec,
            scratch_shapes=[pltpu.VMEM((TB, FEAT), jnp.float32)],
        ),
        compiler_params=pltpu.CompilerParams(
            dimension_semantics=("parallel", "arbitrary"),
            vmem_limit_bytes=vmem_bytes,
        ),
        cost_estimate=pl.CostEstimate(
            flops=flops, transcendentals=m_pad, bytes_accessed=bytes_accessed),
    )(x, w0, b0, w1, b1, w2, b2, w3, b3)

    return out[:M]


def siamese_forward(input1, input2, params):
    """Mirrors SiameseNetwork.forward (shared weights on both inputs).

    Both branches are fused into a single pallas_call by concatenating the two
    flattened inputs along the batch axis, halving HBM weight traffic.
    """
    assert input1.shape == input2.shape
    B = input1.shape[0]
    x = jnp.concatenate(
        [input1.reshape(B, -1), input2.reshape(B, -1)], axis=0)  # [2B, d_in]
    emb = _forward_batch(x, params)
    return emb[:B], emb[B:]


# ---------------------------------------------------------------------------
# Deterministic parameter construction (synthetic, no checkpoint).
# ---------------------------------------------------------------------------
def _linear_init(key, fan_in, fan_out):
    kw, kb = jax.random.split(key)
    bound = 1.0 / jnp.sqrt(jnp.float32(fan_in))
    w = jax.random.uniform(kw, (fan_in, fan_out), jnp.float32, -bound, bound)
    b = jax.random.uniform(kb, (fan_out,), jnp.float32, -bound, bound)
    return w, b


def _bn_init(key, dim):
    kg, kb, km, kv = jax.random.split(key, 4)
    gamma = 1.0 + 0.1 * jax.random.normal(kg, (dim,), jnp.float32)
    beta = 0.1 * jax.random.normal(kb, (dim,), jnp.float32)
    running_mean = 0.1 * jax.random.normal(km, (dim,), jnp.float32)
    running_var = 1.0 + 0.1 * jax.random.uniform(kv, (dim,), jnp.float32)
    return gamma, beta, running_mean, running_var


def _fold_bn(w, b, bn):
    """Fold eval-mode BatchNorm1d into the preceding Linear: y = (xW+b)*s + t."""
    gamma, beta, mean, var = bn
    scale = gamma / jnp.sqrt(var + EPS_BN)
    shift = beta - mean * scale
    return w * scale[None, :], (b * scale + shift).reshape(1, -1)


def make_params(key, d_in):
    k0, k1, k2, k3, kb1, kb2, kb3 = jax.random.split(key, 7)

    # facenet stand-in projection: d_in -> 512
    w0, b0 = _linear_init(k0, d_in, FEAT)
    p0 = (w0, b0.reshape(1, -1))

    # additional head with BN folded in (eval mode)
    w1, b1 = _linear_init(k1, FEAT, H1)
    p1 = _fold_bn(w1, b1, _bn_init(kb1, H1))

    w2, b2 = _linear_init(k2, H1, H2)
    p2 = _fold_bn(w2, b2, _bn_init(kb2, H2))

    w3, b3 = _linear_init(k3, H2, EMBEDDING_DIM)
    p3 = _fold_bn(w3, b3, _bn_init(kb3, EMBEDDING_DIM))

    return [p0, p1, p2, p3]


def _reference_one(x_img, params):
    """Pure-JAX f32 reference of one branch (for tolerance checking)."""
    B = x_img.shape[0]
    h = x_img.reshape(B, -1).astype(jnp.float32)
    (w0, b0), (w1, b1), (w2, b2), (w3, b3) = params
    h = h @ w0 + b0
    h = jnp.maximum(h @ w1 + b1, 0.0)
    h = jnp.maximum(h @ w2 + b2, 0.0)
    h = h @ w3 + b3
    n = jnp.maximum(jnp.linalg.norm(h, axis=1, keepdims=True), EPS_NORM)
    return h / n


if __name__ == "__main__":
    key = jax.random.PRNGKey(0)
    k_x1, k_x2, k_p = jax.random.split(key, 3)

    B, C, H, W = 2, 4, 16, 16  # small synthetic image pair (NCHW)
    x1 = jax.random.normal(k_x1, (B, C, H, W), jnp.float32)
    x2 = jax.random.normal(k_x2, (B, C, H, W), jnp.float32)

    params = make_params(k_p, C * H * W)

    emb1, emb2 = siamese_forward(x1, x2, params)
    emb1, emb2 = jax.block_until_ready((emb1, emb2))

    assert emb1.shape == (B, EMBEDDING_DIM) and emb2.shape == (B, EMBEDDING_DIM)

    # embeddings are unit-norm along dim=1
    n1 = jnp.linalg.norm(emb1, axis=1)
    n2 = jnp.linalg.norm(emb2, axis=1)
    assert bool(jnp.all(jnp.abs(n1 - 1.0) < 1e-3))
    assert bool(jnp.all(jnp.abs(n2 - 1.0) < 1e-3))

    # matches the f32 reference within bf16 tolerance
    ref1 = _reference_one(x1, params)
    ref2 = _reference_one(x2, params)
    assert bool(jnp.max(jnp.abs(emb1 - ref1)) < 5e-2)
    assert bool(jnp.max(jnp.abs(emb2 - ref2)) < 5e-2)

    print("KERNEL_OK")
</pallas_src>

<mosaic_0001>
module attributes {stable_mosaic.version = 11 : i64} {
  func.func @_siamese_head_kernel(%arg0: i32, %arg1: i32, %arg2: memref<16x512xbf16, #tpu.memory_space<vmem>>, %arg3: memref<512x512xbf16, #tpu.memory_space<vmem>>, %arg4: memref<1x512xf32, #tpu.memory_space<vmem>>, %arg5: memref<512x512xbf16, #tpu.memory_space<vmem>>, %arg6: memref<1x512xf32, #tpu.memory_space<vmem>>, %arg7: memref<512x256xbf16, #tpu.memory_space<vmem>>, %arg8: memref<1x256xf32, #tpu.memory_space<vmem>>, %arg9: memref<256x128xbf16, #tpu.memory_space<vmem>>, %arg10: memref<1x128xf32, #tpu.memory_space<vmem>>, %arg11: memref<16x128xf32, #tpu.memory_space<vmem>>, %arg12: memref<16x512xf32, #tpu.memory_space<vmem>>) attributes {dimension_semantics = [#tpu.dimension_semantics<parallel>, #tpu.dimension_semantics<arbitrary>], iteration_bounds = array<i64: 1, 2>, scalar_prefetch = 0 : i64, scratch_operands = 1 : i64, tpu.core_type = #tpu.core_type<tc>, window_params = [{transform_indices = @transform_0, window_bounds = array<i64: 16, 512>}, {transform_indices = @transform_1, window_bounds = array<i64: 512, 512>}, {pipeline_mode = #tpu.pipeline_mode<synchronous>, transform_indices = @transform_2, window_bounds = array<i64: 1, 512>}, {pipeline_mode = #tpu.pipeline_mode<synchronous>, transform_indices = @transform_3, window_bounds = array<i64: 512, 512>}, {pipeline_mode = #tpu.pipeline_mode<synchronous>, transform_indices = @transform_4, window_bounds = array<i64: 1, 512>}, {pipeline_mode = #tpu.pipeline_mode<synchronous>, transform_indices = @transform_5, window_bounds = array<i64: 512, 256>}, {pipeline_mode = #tpu.pipeline_mode<synchronous>, transform_indices = @transform_6, window_bounds = array<i64: 1, 256>}, {pipeline_mode = #tpu.pipeline_mode<synchronous>, transform_indices = @transform_7, window_bounds = array<i64: 256, 128>}, {pipeline_mode = #tpu.pipeline_mode<synchronous>, transform_indices = @transform_8, window_bounds = array<i64: 1, 128>}, {transform_indices = @transform_9, window_bounds = array<i64: 16, 128>}]} {
    %c0_i32 = arith.constant 0 : i32
    %0 = arith.cmpi eq, %arg1, %c0_i32 : i32
    %1 = arith.extui %0 : i1 to i32
    %c0_i32_0 = arith.constant 0 : i32
    %2 = arith.cmpi ne, %1, %c0_i32_0 : i32
    scf.if %2 {
      %cst_9 = arith.constant 0.000000e+00 : f32
      %12 = vector.broadcast %cst_9 : f32 to vector<16x512xf32>
      %c0_10 = arith.constant 0 : index
      %c0_11 = arith.constant 0 : index
      %13 = vector.load %arg12[%c0_10, %c0_11] : memref<16x512xf32, #tpu.memory_space<vmem>>, vector<16x512xf32>
      tpu.vector_store %arg12[%c0_10, %c0_11], %12 {strides = array<i32>} : memref<16x512xf32, #tpu.memory_space<vmem>>, vector<16x512xf32>,
    } else {
    }
    %c0 = arith.constant 0 : index
    %c0_1 = arith.constant 0 : index
    %3 = vector.load %arg12[%c0, %c0_1] : memref<16x512xf32, #tpu.memory_space<vmem>>, vector<16x512xf32>
    %c0_2 = arith.constant 0 : index
    %c0_3 = arith.constant 0 : index
    %4 = vector.load %arg2[%c0_2, %c0_3] : memref<16x512xbf16, #tpu.memory_space<vmem>>, vector<16x512xbf16>
    %c0_4 = arith.constant 0 : index
    %c0_5 = arith.constant 0 : index
    %5 = vector.load %arg3[%c0_4, %c0_5] : memref<512x512xbf16, #tpu.memory_space<vmem>>, vector<512x512xbf16>
    %cst = arith.constant dense<0.000000e+00> : vector<16x512xf32>
    %6 = tpu.matmul %4, %5, %cst {dimension_numbers = #tpu.dot_dimension_numbers<[1], [0], [0], [1], [0, 0, 1, 1], [], []>} : vector<16x512xbf16>, vector<512x512xbf16>, vector<16x512xf32> -> vector<16x512xf32>
    %7 = arith.addf %3, %6 : vector<16x512xf32>
    %c0_6 = arith.constant 0 : index
    %c0_7 = arith.constant 0 : index
    %8 = vector.load %arg12[%c0_6, %c0_7] : memref<16x512xf32, #tpu.memory_space<vmem>>, vector<16x512xf32>
    tpu.vector_store %arg12[%c0_6, %c0_7], %7 {strides = array<i32>} : memref<16x512xf32, #tpu.memory_space<vmem>>, vector<16x512xf32>,
    %c1_i32 = arith.constant 1 : i32
    %9 = arith.cmpi eq, %arg1, %c1_i32 : i32
    %10 = arith.extui %9 : i1 to i32
    %c0_i32_8 = arith.constant 0 : i32
    %11 = arith.cmpi ne, %10, %c0_i32_8 : i32
    scf.if %11 {
      %c0_9 = arith.constant 0 : index
      %c0_10 = arith.constant 0 : index
      %12 = vector.load %arg12[%c0_9, %c0_10] : memref<16x512xf32, #tpu.memory_space<vmem>>, vector<16x512xf32>
      %c0_11 = arith.constant 0 : index
      %c0_12 = arith.constant 0 : index
      %13 = vector.load %arg4[%c0_11, %c0_12] : memref<1x512xf32, #tpu.memory_space<vmem>>, vector<1x512xf32>
      %14 = vector.broadcast %13 : vector<1x512xf32> to vector<16x512xf32>
      %15 = arith.addf %12, %14 : vector<16x512xf32>
      %16 = arith.truncf %15 : vector<16x512xf32> to vector<16x512xbf16>
      %c0_13 = arith.constant 0 : index
      %c0_14 = arith.constant 0 : index
      %17 = vector.load %arg5[%c0_13, %c0_14] : memref<512x512xbf16, #tpu.memory_space<vmem>>, vector<512x512xbf16>
      %cst_15 = arith.constant dense<0.000000e+00> : vector<16x512xf32>
      %18 = tpu.matmul %16, %17, %cst_15 {dimension_numbers = #tpu.dot_dimension_numbers<[1], [0], [0], [1], [0, 0, 1, 1], [], []>} : vector<16x512xbf16>, vector<512x512xbf16>, vector<16x512xf32> -> vector<16x512xf32>
      %c0_16 = arith.constant 0 : index
      %c0_17 = arith.constant 0 : index
      %19 = vector.load %arg6[%c0_16, %c0_17] : memref<1x512xf32, #tpu.memory_space<vmem>>, vector<1x512xf32>
      %20 = vector.broadcast %19 : vector<1x512xf32> to vector<16x512xf32>
      %21 = arith.addf %18, %20 : vector<16x512xf32>
      %cst_18 = arith.constant 0.000000e+00 : f32
      %22 = vector.broadcast %cst_18 : f32 to vector<16x512xf32>
      %23 = arith.maximumf %21, %22 : vector<16x512xf32>
      %24 = arith.truncf %23 : vector<16x512xf32> to vector<16x512xbf16>
      %c0_19 = arith.constant 0 : index
      %c0_20 = arith.constant 0 : index
      %25 = vector.load %arg7[%c0_19, %c0_20] : memref<512x256xbf16, #tpu.memory_space<vmem>>, vector<512x256xbf16>
      %cst_21 = arith.constant dense<0.000000e+00> : vector<16x256xf32>
      %26 = tpu.matmul %24, %25, %cst_21 {dimension_numbers = #tpu.dot_dimension_numbers<[1], [0], [0], [1], [0, 0, 1, 1], [], []>} : vector<16x512xbf16>, vector<512x256xbf16>, vector<16x256xf32> -> vector<16x256xf32>
      %c0_22 = arith.constant 0 : index
      %c0_23 = arith.constant 0 : index
      %27 = vector.load %arg8[%c0_22, %c0_23] : memref<1x256xf32, #tpu.memory_space<vmem>>, vector<1x256xf32>
      %28 = vector.broadcast %27 : vector<1x256xf32> to vector<16x256xf32>
      %29 = arith.addf %26, %28 : vector<16x256xf32>
      %cst_24 = arith.constant 0.000000e+00 : f32
      %30 = vector.broadcast %cst_24 : f32 to vector<16x256xf32>
      %31 = arith.maximumf %29, %30 : vector<16x256xf32>
      %32 = arith.truncf %31 : vector<16x256xf32> to vector<16x256xbf16>
      %c0_25 = arith.constant 0 : index
      %c0_26 = arith.constant 0 : index
      %33 = vector.load %arg9[%c0_25, %c0_26] : memref<256x128xbf16, #tpu.memory_space<vmem>>, vector<256x128xbf16>
      %cst_27 = arith.constant dense<0.000000e+00> : vector<16x128xf32>
      %34 = tpu.matmul %32, %33, %cst_27 {dimension_numbers = #tpu.dot_dimension_numbers<[1], [0], [0], [1], [0, 0, 1, 1], [], []>} : vector<16x256xbf16>, vector<256x128xbf16>, vector<16x128xf32> -> vector<16x128xf32>
      %c0_28 = arith.constant 0 : index
      %c0_29 = arith.constant 0 : index
      %35 = vector.load %arg10[%c0_28, %c0_29] : memref<1x128xf32, #tpu.memory_space<vmem>>, vector<1x128xf32>
      %36 = vector.broadcast %35 : vector<1x128xf32> to vector<16x128xf32>
      %37 = arith.addf %34, %36 : vector<16x128xf32>
      %38 = arith.mulf %37, %37 : vector<16x128xf32>
      %cst_30 = arith.constant dense<0.000000e+00> : vector<16xf32>
      %39 = vector.multi_reduction <add>, %38, %cst_30 [1] : vector<16x128xf32> to vector<16xf32>
      %40 = vector.shape_cast %39 : vector<16xf32> to vector<16x1xf32>
      %cst_31 = arith.constant 1.000000e-24 : f32
      %41 = vector.broadcast %cst_31 : f32 to vector<16x1xf32>
      %42 = arith.maximumf %40, %41 : vector<16x1xf32>
      %43 = math.rsqrt %42 : vector<16x1xf32>
      %44 = vector.broadcast %43 : vector<16x1xf32> to vector<16x128xf32>
      %45 = arith.mulf %37, %44 : vector<16x128xf32>
      %c0_32 = arith.constant 0 : index
      %c0_33 = arith.constant 0 : index
      %46 = vector.load %arg11[%c0_32, %c0_33] : memref<16x128xf32, #tpu.memory_space<vmem>>, vector<16x128xf32>
      tpu.vector_store %arg11[%c0_32, %c0_33], %45 {strides = array<i32>} : memref<16x128xf32, #tpu.memory_space<vmem>>, vector<16x128xf32>,
    } else {
    }
    return
  }
  func.func @transform_0(%arg0: i32, %arg1: i32) -> (i32, i32) {
    %c0_i32 = arith.constant 0 : i32
    return %arg0, %arg1 : i32, i32
  }
  func.func @transform_1(%arg0: i32, %arg1: i32) -> (i32, i32) {
    %c0_i32 = arith.constant 0 : i32
    %c0_i32_0 = arith.constant 0 : i32
    return %arg1, %c0_i32 : i32, i32
  }
  func.func @transform_2(%arg0: i32, %arg1: i32) -> (i32, i32) {
    %c0_i32 = arith.constant 0 : i32
    %c0_i32_0 = arith.constant 0 : i32
    %c0_i32_1 = arith.constant 0 : i32
    return %c0_i32, %c0_i32_0 : i32, i32
  }
  func.func @transform_3(%arg0: i32, %arg1: i32) -> (i32, i32) {
    %c0_i32 = arith.constant 0 : i32
    %c0_i32_0 = arith.constant 0 : i32
    %c0_i32_1 = arith.constant 0 : i32
    return %c0_i32, %c0_i32_0 : i32, i32
  }
  func.func @transform_4(%arg0: i32, %arg1: i32) -> (i32, i32) {
    %c0_i32 = arith.constant 0 : i32
    %c0_i32_0 = arith.constant 0 : i32
    %c0_i32_1 = arith.constant 0 : i32
    return %c0_i32, %c0_i32_0 : i32, i32
  }
  func.func @transform_5(%arg0: i32, %arg1: i32) -> (i32, i32) {
    %c0_i32 = arith.constant 0 : i32
    %c0_i32_0 = arith.constant 0 : i32
    %c0_i32_1 = arith.constant 0 : i32
    return %c0_i32, %c0_i32_0 : i32, i32
  }
  func.func @transform_6(%arg0: i32, %arg1: i32) -> (i32, i32) {
    %c0_i32 = arith.constant 0 : i32
    %c0_i32_0 = arith.constant 0 : i32
    %c0_i32_1 = arith.constant 0 : i32
    return %c0_i32, %c0_i32_0 : i32, i32
  }
  func.func @transform_7(%arg0: i32, %arg1: i32) -> (i32, i32) {
    %c0_i32 = arith.constant 0 : i32
    %c0_i32_0 = arith.constant 0 : i32
    %c0_i32_1 = arith.constant 0 : i32
    return %c0_i32, %c0_i32_0 : i32, i32
  }
  func.func @transform_8(%arg0: i32, %arg1: i32) -> (i32, i32) {
    %c0_i32 = arith.constant 0 : i32
    %c0_i32_0 = arith.constant 0 : i32
    %c0_i32_1 = arith.constant 0 : i32
    return %c0_i32, %c0_i32_0 : i32, i32
  }
  func.func @transform_9(%arg0: i32, %arg1: i32) -> (i32, i32) {
    %c0_i32 = arith.constant 0 : i32
    %c0_i32_0 = arith.constant 0 : i32
    return %arg0, %c0_i32 : i32, i32
  }
}

</mosaic_0001>

<bundles_post_ra>
// kernel: tpu_custom_call.1
= control target key start
LH: loop header
LB: loop body
LE: loop exit
PB: predicated region body
PF: predicated region fallthrough
CT: control target
= control target key end

     0   :  { %s5028_s0 = inlined_call_operand.hbm [shape: bf16[16,1024], index: 0, kind: input, shape index: {}]   ;;  %s5029_s1 = inlined_call_operand.hbm [shape: bf16[1024,512], index: 1, kind: input, shape index: {}]   ;;  %s5030_s2 = inlined_call_operand.hbm [shape: f32[1,512], index: 2, kind: input, shape index: {}]   ;;  %s5031_s3 = inlined_call_operand.hbm [shape: bf16[512,512], index: 3, kind: input, shape index: {}]   ;;  %s5032_s4 = inlined_call_operand.vmem [shape: f32[1,512], index: 4, kind: input, shape index: {}]   ;;  %s5033_s5 = inlined_call_operand.hbm [shape: bf16[512,256], index: 5, kind: input, shape index: {}]   ;;  %s5034_s6 = inlined_call_operand.vmem [shape: f32[1,256], index: 6, kind: input, shape index: {}]   ;;  %s5035_s7 = inlined_call_operand.hbm [shape: bf16[256,128], index: 7, kind: input, shape index: {}]   ;;  %s5036_s8 = inlined_call_operand.vmem [shape: f32[1,128], index: 8, kind: input, shape index: {}]   ;;  %s5037_s9 = inlined_call_operand.hbm [shape: f32[16,128], index: 9, kind: output, shape index: {}]  }
   0x1   :  { %5048 = sst [smem:[#allocation25_spill]] %s5028_s0 }
   0x2   :  { %5049 = sst [smem:[#allocation26_spill]] %s5030_s2 }
   0x3   :  { %5050 = sst [smem:[#allocation27_spill]] %s5031_s3 }
   0x4   :  { %5051 = sst [smem:[#allocation28_spill]] %s5033_s5 }
   0x5   :  { %5052 = sst [smem:[#allocation29_spill]] %s5035_s7 }
   0x6   :  { %14 = vsyncpa [#allocation4], 0 }
   0x7   :  { %16 = vsyncpa [#allocation4 + $0x1], 0 }
   0x8   :  { %17 = vsyncpa [#allocation7], 0 }
   0x9   :  { %19 = vsyncpa [#allocation7 + $0x1], 0 }
   0xa   :  { %20 = vsyncpa [#allocation10], 0 }
   0xb   :  { %21 = vsyncpa [#allocation13], 0 }
   0xc   :  { %22 = vsyncpa [#allocation5], 0  ;;  %s4638_s30 = smov 0   ;;  %s4640_s10 = smov 0  }
   0xd   :  { %s4642_s11 = smov 0   ;;  %s4644_s12 = smov 0  }
   0xe   :  { %s4646_s13 = smov 0   ;;  %s4648_s14 = smov 0  }
   0xf LB: > { %5053 = sst [smem:[#allocation21_spill]] %s4557_s11  ;;  %s4667_s15 = sadd.s32 4294967295, %s4569_s14   ;;  %s4569_s14 = sphi %s4648_s14, %s28_s14   ;;  %s4565_s13 = sphi %s4646_s13, %s5083_s13   ;;  %s4561_s12 = sphi %s4644_s12, %s5082_s12   ;;  %s4557_s11 = sphi %s4642_s11, %s5078_s11   ;;  %s4553_s10 = sphi %s4640_s10, %s5081_s10   ;;  %s4549_s30 = sphi %s4638_s30, %s5080_s30  }
  0x10   : > { %5054 = sst [smem:[#allocation22_spill]] %s4569_s14  ;;  %p62_p0 = scmp.ne.s32.totalorder %s4553_s10, %s4549_s30 }
  0x11   : > { %p5038_p1 = scmp.eq.s32.totalorder %s4667_s15, 0  ;;  %p3299_p2 = scmp.ge.s32.totalorder %s4569_s14, 1 }
  0x12   : > { %p272_p3 = scmp.lt.s32.totalorder %s4569_s14, 3  ;;  %s4571_s18 = smov [#allocation8]  }
  0x13   : > { %p4675_p4 = por %p5038_p1, %p62_p0  ;;  %s285_s19 = sshll.u32 %s4571_s18, 4  ;;  %s286_s19 = int_to_ptr.vmem [resolvable:$true] %s285_s19 }
  0x14   : > { %p4679_p5 = pnand %p3299_p2, %p272_p3  ;;  %s4572_s20 = smov [#allocation9]  }
  0x15   : > { %s5055_s16 = scalar_select %p4675_p4, 1, 0 }
  0x16   : > { %s5056_s17 = scalar_select %p4679_p5, 1, 0 }
  0x17   : > { %p3715_p6 = pneg %p4679_p5  ;;  %s295_s21 = sshll.u32 %s4572_s20, 4  ;;  %s296_s21 = int_to_ptr.vmem [resolvable:$true] %s295_s21 }
  0x18   : > { %s4573_s23 = smov [#allocation11]   ;;  %s4326_s25 = scalar_lea.vmem %s286_s19, 64 }
  0x19   : > { %p4687_p7 = pnand %p3715_p6, %p5038_p1  ;;  %s311_s24 = sshll.u32 %s4573_s23, 4  ;;  %s312_s24 = int_to_ptr.vmem [resolvable:$true] %s311_s24 }
  0x1a   : > { %p4327_p9 = scmp.ne.s32.totalorder %s286_s19, %s4326_s25  ;;  %p4334_p12 = scmp.lt.s32.totalorder %s286_s19, %s286_s19 }
  0x1b   : > { %p4317_p8 = pneg %p4687_p7  ;;  %p4335_p13 = scmp.lt.s32.totalorder %s4326_s25, %s4326_s25 }
  0x1d   : > { %p4329_p10 = pnand %p4327_p9, %p4317_p8  ;;  %p4336_p0 = por %p4335_p13, %p4334_p12 }
  0x1f   : > { %p4330_p11 = pneg %p4329_p10 }
  0x21   : > { %p4337_p2 = pnand %p4336_p0, %p4330_p11 }
  0x23   : > { %4340 = shalt.err (!%p4337_p2)
}
  0x24   : > { %s5058_s2 = sld [smem:[#allocation26_spill]]  ;;  %s4352_s28 = scalar_lea.vmem %s296_s21, 16384 }
  0x25   : > { %p4353_p3 = scmp.ne.s32.totalorder %s296_s21, %s4352_s28  ;;  %p4360_p9 = scmp.lt.s32.totalorder %s296_s21, %s296_s21 }
  0x26   : > { %p4361_p10 = scmp.lt.s32.totalorder %s4352_s28, %s4352_s28 }
  0x27   : > { %p4355_p6 = pnand %p4353_p3, %p4317_p8 }
  0x28   : > { %p4362_p4 = por %p4361_p10, %p4360_p9 }
  0x29   : > { %p4356_p1 = pneg %p4355_p6 }
  0x2a   : > { %3718 = dma.hbm_to_vmem [thread:$0]  (!%p4687_p7), %s5058_s2, 64, %s286_s19, [#allocation7]  }
  0x2b   : > { %p4363_p5 = pnand %p4362_p4, %p4356_p1 }
  0x2d   : > { %4366 = shalt.err (!%p4363_p5)
}
  0x2e   : > { %s5041_s29 = smov 256   ;;  %s5043_s30 = smov 16  }
  0x2f   : > { %s5059_s3 = sld [smem:[#allocation27_spill]]  ;;  %s4378_s20 = scalar_lea.vmem %s312_s24, 8192 }
  0x30   : > { %p4379_p11 = scmp.ne.s32.totalorder %s312_s24, %s4378_s20  ;;  %p4386_p4 = scmp.lt.s32.totalorder %s312_s24, %s312_s24 }
  0x31   : > { %p4387_p5 = scmp.lt.s32.totalorder %s4378_s20, %s4378_s20 }
  0x32   : > { %p4381_p12 = pnand %p4379_p11, %p4317_p8 }
  0x33   : > { %p4388_p13 = por %p4387_p5, %p4386_p4 }
  0x34   : > { %p4382_p1 = pneg %p4381_p12 }
  0x35   : > { %3721 = dma.hbm_to_vmem [thread:$0]  (!%p4687_p7), %s5059_s3, 16384, %s296_s21, [#allocation10], %s5041_s29, %s5041_s29, %s5043_s30  }
  0x36   : > { %p4389_p0 = pnand %p4388_p13, %p4382_p1 }
  0x38   : > { %4392 = shalt.err (!%p4389_p0)
}
  0x39   : > { %s4576_s23 = smov 128   ;;  %s4577_s25 = smov 8  }
  0x3a   : > { %s5060_s5 = sld [smem:[#allocation28_spill]]  ;;  %s4578_s21 = smov [#allocation12]  }
  0x3b   : > { %s327_s28 = sshll.u32 %s4578_s21, 4  ;;  %s328_s28 = int_to_ptr.vmem [resolvable:$true] %s327_s28 }
  0x3c   : > { %s4404_s18 = scalar_lea.vmem %s328_s28, 2048  ;;  %p4412_p9 = scmp.lt.s32.totalorder %s328_s28, %s328_s28 }
  0x3d   : > { %p4405_p2 = scmp.ne.s32.totalorder %s328_s28, %s4404_s18  ;;  %p4413_p10 = scmp.lt.s32.totalorder %s4404_s18, %s4404_s18 }
  0x3f   : > { %p4407_p3 = pnand %p4405_p2, %p4317_p8  ;;  %p4414_p11 = por %p4413_p10, %p4412_p9 }
  0x40   : > { %3724 = dma.hbm_to_vmem [thread:$0]  (!%p4687_p7), %s5060_s5, 8192, %s312_s24, [#allocation10], %s4576_s23, %s4576_s23, %s4577_s25  }
  0x41   : > { %p4408_p6 = pneg %p4407_p3 }
  0x43   : > { %p4415_p12 = pnand %p4414_p11, %p4408_p6 }
  0x45   : > { %4418 = shalt.err (!%p4415_p12)
}
  0x46   : > { %s4579_s19 = smov 64   ;;  %s4580_s24 = smov 4  }
  0x47   : > { %s5061_s7 = sld [smem:[#allocation29_spill]]  ;;  %s37_s25 = sadd.s32 1, %s4565_s13 }
  0x48   : > { %s49_s26 = sadd.s32 1, %s4557_s11  ;;  %p38_p8 = scmp.ge.s32.totalorder %s37_s25, 2 }
  0x49   : > { %p56_p1 = scmp.ne.s32.totalorder %s4557_s11, %s4553_s10  ;;  %p57_p4 = scmp.eq.s32.totalorder %s4569_s14, 0 }
  0x4a   : > { %p3739_p5 = scmp.lt.s32.totalorder %s4569_s14, 2  ;;  %s5085_s25 = smov (%p38_p8, %s37_s25), 0 }
  0x4b   : > { %5062 = sst [smem:[#allocation23_spill]] %s5085_s25  ;;  %p58_p13 = por %p57_p4, %p56_p1 }
  0x4c   : > { %s4737_s27 = sand.u32 1, %s4557_s11   ;;  %s45_s22 = ssub.s32 %s4565_s13, %s5085_s25 }
  0x4d   : > { %3727 = dma.hbm_to_vmem [thread:$0]  (!%p4687_p7), %s5061_s7, 2048, %s328_s28, [#allocation13], %s4579_s19, %s4579_s19, %s4580_s24  }
  0x4e   : > { %p47_p0 = scmp.eq.s32.totalorder %s45_s22, 0  ;;  %s3305_s21 = sshll.u32 %s4737_s27, 5 }
  0x4f   : > { %s3666_s28 = sshll.u32 %s4565_s13, 8  ;;  %s5064_s0 = sld [smem:[#allocation25_spill]] }
  0x50   : > { %s4744_s18 = scalar_select %p47_p0, %s4557_s11, %s49_s26  }
  0x51   : > { %s348_s23 = scalar_lea.vmem [#allocation3], %s3305_s21  ;;  %p4751_p7 = pnand %p3739_p5, %p58_p13 }
  0x52   : > { %5063 = sst [smem:[#allocation24_spill]] %s4744_s18  ;;  %s358_s29 = sshll.u32 %s348_s23, 4  ;;  %s359_s29 = int_to_ptr.vmem [resolvable:$true] %s358_s29 }
  0x53   : > { %s368_s2 = sand.u32 1, %s4569_s14   ;;  %s345_s22 = scalar_lea.sflag [#allocation4], %s4737_s27 }
  0x54   : > { %p4421_p2 = pneg %p4751_p7  ;;  %s4432_s26 = scalar_lea.vmem %s359_s29, 512 }
  0x55   : > { %s357_s20 = scalar_lea.hbm %s5064_s0, %s3666_s28  ;;  %p4433_p3 = scmp.ne.s32.totalorder %s359_s29, %s4432_s26 }
  0x56   : > { %s4581_s21 = smov [#allocation3]  }
  0x57   : > { %p4435_p6 = pnand %p4433_p3, %p4421_p2  ;;  %s4437_s28 = sshll.u32 %s4581_s21, 4  ;;  %s4438_s28 = int_to_ptr.vmem [resolvable:$false] %s4437_s28 }
  0x58   : > { %s4439_s19 = scalar_lea.vmem %s4438_s28, 1024  ;;  %p4440_p10 = scmp.lt.s32.totalorder %s359_s29, %s4438_s28 }
  0x59   : > { %p4436_p9 = pneg %p4435_p6  ;;  %p4441_p11 = scmp.lt.s32.totalorder %s4439_s19, %s4432_s26 }
  0x5b   : > { %p4442_p12 = por %p4441_p11, %p4440_p10 }
  0x5d   : > { %p4443_p8 = pnand %p4442_p12, %p4436_p9 }
  0x5f   : > { %4446 = shalt.err (!%p4443_p8)
}
  0x60   : > { %s4582_s24 = smov 512   ;;  %s5066_s23 = smov 16  }
  0x61   : > { %s5067_s0 = smov 256   ;;  %s3308_s3 = sshll.u32 %s4737_s27, 10 }
  0x62   : > { %3731 = dma.hbm_to_vmem [thread:$0]  (!%p4751_p7), %s357_s20, 512, %s359_s29, %s345_s22, %s4582_s24, %s5067_s0, %s5066_s23  }
  0x63   : > { %s3668_s5 = sshll.u32 %s4565_s13, 14  ;;  %s372_s28 = scalar_lea.vmem [#allocation6], %s3308_s3 }
  0x64   : > { %s379_s25 = scalar_lea.hbm %s5029_s1, %s3668_s5  ;;  %s380_s26 = sshll.u32 %s372_s28, 4  ;;  %s381_s26 = int_to_ptr.vmem [resolvable:$true] %s380_s26 }
  0x65   : > { %s369_s19 = scalar_lea.sflag [#allocation7], %s368_s2  ;;  %s4460_s18 = scalar_lea.vmem %s381_s26, 16384 }
  0x66   : > { %p4461_p1 = scmp.ne.s32.totalorder %s381_s26, %s4460_s18  ;;  %s4583_s11 = smov [#allocation6]  }
  0x67   : > { %s4465_s14 = sshll.u32 %s4583_s11, 4  ;;  %s4466_s14 = int_to_ptr.vmem [resolvable:$false] %s4465_s14 }
  0x68   : > { %p4463_p4 = pnand %p4461_p1, %p4421_p2  ;;  %s4467_s29 = scalar_lea.vmem %s4466_s14, 32768 }
  0x69   : > { %p4468_p13 = scmp.lt.s32.totalorder %s381_s26, %s4466_s14  ;;  %p4469_p0 = scmp.lt.s32.totalorder %s4467_s29, %s4460_s18 }
  0x6a   : > { %p4464_p5 = pneg %p4463_p4 }
  0x6b   : > { %p4470_p3 = por %p4469_p0, %p4468_p13 }
  0x6d   : > { %p4471_p6 = pnand %p4470_p3, %p4464_p5 }
  0x6f   : > { %4474 = shalt.err (!%p4471_p6)
}
  0x70   : > { %3734 = dma.hbm_to_vmem [thread:$0]  (!%p4751_p7), %s379_s25, 16384, %s381_s26, %s369_s19, %s5067_s0, %s5067_s0, %s5066_s23  }
  0x71   : > { %p5068_p9 = scmp.ne.s32.totalorder %s5056_s17, 0 }
  0x72   : > { %s394_s2 = sand.u32 (!%p5068_p9), 1, %s4553_s10   ;;  %p5069_p2 = scmp.ne.s32.totalorder (!%p5068_p9), %s5055_s16, 0 }
  0x73   : > { %392 = sbr.rel (%p5068_p9) target bundleno = 1400 (0x578), region = 56  ;;  %s3313_s3 = sshll.u32 (!%p5068_p9), %s394_s2, 5 }
  0x74   : > { %s395_s5 = scalar_lea.sflag (!%p5068_p9), [#allocation4], %s394_s2  ;;  %s4782_s7 = scalar_lea.vmem (!%p5068_p9), [#allocation3], %s3313_s3 }
  0x78   : > { %4524 = dma.done.wait (%p5069_p2), %s395_s5, 512  }
  0x79   : > { %4526 = vsyncadd (%p5069_p2), %s395_s5, 4294966784  ;;  %s403_s11 = sand.u32 1, %s4667_s15   ;;  %s3314_s14 = sshll.u32 %s394_s2, 10 }
  0x7a   : > { %s404_s0 = scalar_lea.sflag [#allocation7], %s403_s11  ;;  %s4789_s30 = scalar_lea.vmem [#allocation6], %s3314_s14 }
  0x7b   : > { %4528 = dma.done.wait (%p5069_p2), %s404_s0, 16384  }
  0x7c   : > { %4530 = vsyncadd (%p5069_p2), %s404_s0, 4294950912  ;;  %p5070_p7 = scmp.eq.s32.totalorder %s4667_s15, 0 }
  0x7e   : > { %4532 = dma.done.wait (%p5070_p7), [#allocation7], 64   ;;  %p5071_p10 = pmov %p5070_p7 }
  0x7f   : > { %p5072_p11 = pmov %p5070_p7 }
  0x80   : > { %4534 = vsyncadd (%p5071_p10), [#allocation7], 4294967232 }
  0x81   : > { %4536 = dma.done.wait (%p5072_p11), [#allocation10], 24576   ;;  %p5073_p12 = pmov %p5070_p7 }
  0x82   : > { %p5074_p8 = pmov %p5070_p7 }
  0x83   : > { %4538 = vsyncadd (%p5073_p12), [#allocation10], 4294942720 }
  0x84   : > { %4540 = dma.done.wait (%p5074_p8), [#allocation13], 2048   ;;  %p5075_p1 = pmov %p5070_p7 }
  0x85   : > { %p3319_p4 = scmp.ne.s32.totalorder %s4561_s12, 0 }
  0x86   : > { %4542 = vsyncadd (%p5075_p1), [#allocation13], 4294965248 }
  0x87   : > { %466 = sbr.rel (%p3319_p4) target bundleno = 145 (0x91), region = 84 }
  0x8c   : > { %v4584_v0 = vmov 0.0  }
  0x8d   : > { %467 = vst [vmem:[#allocation2 + $0x30] sm:$0xff] %v4584_v0  ;;  %468 = vst [vmem:[#allocation2] sm:$0xff] %v4584_v0 }
  0x8e   : > { %469 = vst [vmem:[#allocation2 + $0x18] sm:$0xff] %v4584_v0  ;;  %470 = vst [vmem:[#allocation2 + $0x10] sm:$0xff] %v4584_v0 }
  0x8f   : > { %471 = vst [vmem:[#allocation2 + $0x8] sm:$0xff] %v4584_v0  ;;  %472 = vst [vmem:[#allocation2 + $0x20] sm:$0xff] %v4584_v0 }
  0x90   : > { %473 = vst [vmem:[#allocation2 + $0x28] sm:$0xff] %v4584_v0  ;;  %474 = vst [vmem:[#allocation2 + $0x38] sm:$0xff] %v4584_v0 }
  0x91 PF: > { %v3809_v1 = vld [vmem:[%s4789_s30 + $0xe4] ss:$16 sps:$4 sm:$0xff]   ;;  %v3813_v3 = vld [vmem:[%s4789_s30 + $0xe0] ss:$16 sps:$4 sm:$0xff]   ;;  %v3910_v52 = vld [vmem:[%s4782_s7 + $0xc] ss:$16 sps:$4 sm:$0xff]  }
  0x92   : > { %v3811_v2 = vld [vmem:[%s4789_s30 + $0x2e4] ss:$16 sps:$4 sm:$0xff]   ;;  %1275 = vmatprep.subr.bf16.mxu0 %v3809_v1  ;;  %v3814_v4 = vld [vmem:[%s4789_s30 + $0x2e0] ss:$16 sps:$4 sm:$0xff]   ;;  %1350 = vmatprep.mubr.bf16.mxu1 %v3910_v52  ;;  %p3452_p5 = scmp.ne.s32.totalorder %s4561_s12, 1 }
  0x93   : > { %1318 = vmatprep.subr.bf16.mxu1 %v3811_v2  ;;  %v3815_v5 = vld [vmem:[%s4789_s30 + $0xc4] ss:$16 sps:$4 sm:$0xff]   ;;  %1276 = vmatpush1.bf16.msra.mxu0 %v3813_v3  ;;  %v3819_v7 = vld [vmem:[%s4789_s30 + $0xc0] ss:$16 sps:$4 sm:$0xff]   ;;  %v3913_v3 = vld [vmem:[%s4789_s30 + $0xec] ss:$16 sps:$4 sm:$0xff]  }
  0x94   : > { %1319 = vmatpush1.bf16.msra.mxu1 %v3814_v4  ;;  %v3817_v6 = vld [vmem:[%s4789_s30 + $0x2c4] ss:$16 sps:$4 sm:$0xff]   ;;  %1277 = vmatprep.subr.bf16.mxu0 %v3815_v5  ;;  %v3820_v8 = vld [vmem:[%s4789_s30 + $0x2c0] ss:$16 sps:$4 sm:$0xff]   ;;  %v3916_v4 = vld [vmem:[%s4789_s30 + $0x2ec] ss:$16 sps:$4 sm:$0xff]  }
  0x95   : > { %1320 = vmatprep.subr.bf16.mxu1 %v3817_v6  ;;  %v3821_v9 = vld [vmem:[%s4789_s30 + $0xa4] ss:$16 sps:$4 sm:$0xff]   ;;  %v3825_v11 = vld [vmem:[%s4789_s30 + $0xa0] ss:$16 sps:$4 sm:$0xff]   ;;  %v4880_v6 = vld [vmem:[%s4782_s7 + $0x8] ss:$16 sps:$4 sm:$0xff]  }
  0x96   : > { %v3823_v10 = vld [vmem:[%s4789_s30 + $0x2a4] ss:$16 sps:$4 sm:$0xff]   ;;  %v3826_v12 = vld [vmem:[%s4789_s30 + $0x2a0] ss:$16 sps:$4 sm:$0xff]  }
  0x97   : > { %1278 = vmatpush1.bf16.msra.mxu0 %v3819_v7  ;;  %v3827_v13 = vld [vmem:[%s4789_s30 + $0x84] ss:$16 sps:$4 sm:$0xff]   ;;  %v3831_v15 = vld [vmem:[%s4789_s30 + $0x80] ss:$16 sps:$4 sm:$0xff]   ;;  %v3911_v7 = vld [vmem:[%s4789_s30 + $0xe8] ss:$16 sps:$4 sm:$0xff]  }
  0x98   : > { %1321 = vmatpush1.bf16.msra.mxu1 %v3820_v8  ;;  %1279 = vmatprep.subr.bf16.mxu0 %v3821_v9  ;;  %v3829_v14 = vld [vmem:[%s4789_s30 + $0x284] ss:$16 sps:$4 sm:$0xff]   ;;  %v3832_v16 = vld [vmem:[%s4789_s30 + $0x280] ss:$16 sps:$4 sm:$0xff]   ;;  %v3914_v8 = vld [vmem:[%s4789_s30 + $0x2e8] ss:$16 sps:$4 sm:$0xff]  }
  0x99   : > { %1322 = vmatprep.subr.bf16.mxu1 %v3823_v10  ;;  %v3833_v17 = vld [vmem:[%s4789_s30 + $0x64] ss:$16 sps:$4 sm:$0xff]   ;;  %v3837_v19 = vld [vmem:[%s4789_s30 + $0x60] ss:$16 sps:$4 sm:$0xff]   ;;  %v3919_v9 = vld [vmem:[%s4789_s30 + $0xcc] ss:$16 sps:$4 sm:$0xff]  }
  0x9a   : > { %v3835_v18 = vld [vmem:[%s4789_s30 + $0x264] ss:$16 sps:$4 sm:$0xff]   ;;  %v3838_v20 = vld [vmem:[%s4789_s30 + $0x260] ss:$16 sps:$4 sm:$0xff]   ;;  %v3922_v10 = vld [vmem:[%s4789_s30 + $0x2cc] ss:$16 sps:$4 sm:$0xff]  }
  0x9b   : > { %1280 = vmatpush1.bf16.msra.mxu0 %v3825_v11  ;;  %v3839_v21 = vld [vmem:[%s4789_s30 + $0x44] ss:$16 sps:$4 sm:$0xff]   ;;  %v3843_v23 = vld [vmem:[%s4789_s30 + $0x40] ss:$16 sps:$4 sm:$0xff]   ;;  %v3917_v11 = vld [vmem:[%s4789_s30 + $0xc8] ss:$16 sps:$4 sm:$0xff]  }
  0x9c   : > { %1323 = vmatpush1.bf16.msra.mxu1 %v3826_v12  ;;  %1281 = vmatprep.subr.bf16.mxu0 %v3827_v13  ;;  %v3841_v22 = vld [vmem:[%s4789_s30 + $0x244] ss:$16 sps:$4 sm:$0xff]   ;;  %v3844_v24 = vld [vmem:[%s4789_s30 + $0x240] ss:$16 sps:$4 sm:$0xff]   ;;  %v3920_v12 = vld [vmem:[%s4789_s30 + $0x2c8] ss:$16 sps:$4 sm:$0xff]  }
  0x9d   : > { %1324 = vmatprep.subr.bf16.mxu1 %v3829_v14  ;;  %v3845_v25 = vld [vmem:[%s4789_s30 + $0x24] ss:$16 sps:$4 sm:$0xff]   ;;  %v3849_v27 = vld [vmem:[%s4789_s30 + $0x20] ss:$16 sps:$4 sm:$0xff]   ;;  %v3925_v13 = vld [vmem:[%s4789_s30 + $0xac] ss:$16 sps:$4 sm:$0xff]  }
  0x9e   : > { %v3847_v26 = vld [vmem:[%s4789_s30 + $0x224] ss:$16 sps:$4 sm:$0xff]   ;;  %v3850_v28 = vld [vmem:[%s4789_s30 + $0x220] ss:$16 sps:$4 sm:$0xff]   ;;  %v3928_v14 = vld [vmem:[%s4789_s30 + $0x2ac] ss:$16 sps:$4 sm:$0xff]  }
  0x9f   : > { %1282 = vmatpush1.bf16.msra.mxu0 %v3831_v15  ;;  %v3851_v29 = vld [vmem:[%s4789_s30 + $0x4] ss:$16 sps:$4 sm:$0xff]   ;;  %v3855_v31 = vld [vmem:[%s4789_s30] ss:$16 sps:$4 sm:$0xff]   ;;  %v3923_v15 = vld [vmem:[%s4789_s30 + $0xa8] ss:$16 sps:$4 sm:$0xff]  }
  0xa0   : > { %1325 = vmatpush1.bf16.msra.mxu1 %v3832_v16  ;;  %1283 = vmatprep.subr.bf16.mxu0 %v3833_v17  ;;  %v3853_v30 = vld [vmem:[%s4789_s30 + $0x204] ss:$16 sps:$4 sm:$0xff]   ;;  %v3856_v32 = vld [vmem:[%s4789_s30 + $0x200] ss:$16 sps:$4 sm:$0xff]   ;;  %v3926_v16 = vld [vmem:[%s4789_s30 + $0x2a8] ss:$16 sps:$4 sm:$0xff]  }
  0xa1   : > { %1326 = vmatprep.subr.bf16.mxu1 %v3835_v18  ;;  %v3857_v33 = vld [vmem:[%s4789_s30 + $0x1e4] ss:$16 sps:$4 sm:$0xff]   ;;  %v3861_v35 = vld [vmem:[%s4789_s30 + $0x1e0] ss:$16 sps:$4 sm:$0xff]   ;;  %v3931_v17 = vld [vmem:[%s4789_s30 + $0x8c] ss:$16 sps:$4 sm:$0xff]  }
  0xa2   : > { %v3859_v34 = vld [vmem:[%s4789_s30 + $0x3e4] ss:$16 sps:$4 sm:$0xff]   ;;  %v3862_v36 = vld [vmem:[%s4789_s30 + $0x3e0] ss:$16 sps:$4 sm:$0xff]   ;;  %v3934_v18 = vld [vmem:[%s4789_s30 + $0x28c] ss:$16 sps:$4 sm:$0xff]  }
  0xa3   : > { %1284 = vmatpush1.bf16.msra.mxu0 %v3837_v19  ;;  %v3863_v37 = vld [vmem:[%s4789_s30 + $0x1c4] ss:$16 sps:$4 sm:$0xff]   ;;  %v3867_v39 = vld [vmem:[%s4789_s30 + $0x1c0] ss:$16 sps:$4 sm:$0xff]   ;;  %v3929_v19 = vld [vmem:[%s4789_s30 + $0x88] ss:$16 sps:$4 sm:$0xff]  }
  0xa4   : > { %1327 = vmatpush1.bf16.msra.mxu1 %v3838_v20  ;;  %1285 = vmatprep.subr.bf16.mxu0 %v3839_v21  ;;  %v3865_v38 = vld [vmem:[%s4789_s30 + $0x3c4] ss:$16 sps:$4 sm:$0xff]   ;;  %v3868_v40 = vld [vmem:[%s4789_s30 + $0x3c0] ss:$16 sps:$4 sm:$0xff]   ;;  %v3932_v20 = vld [vmem:[%s4789_s30 + $0x288] ss:$16 sps:$4 sm:$0xff]  }
  0xa5   : > { %1328 = vmatprep.subr.bf16.mxu1 %v3841_v22  ;;  %v3869_v41 = vld [vmem:[%s4789_s30 + $0x1a4] ss:$16 sps:$4 sm:$0xff]   ;;  %v3873_v43 = vld [vmem:[%s4789_s30 + $0x1a0] ss:$16 sps:$4 sm:$0xff]   ;;  %v3937_v21 = vld [vmem:[%s4789_s30 + $0x6c] ss:$16 sps:$4 sm:$0xff]  }
  0xa6   : > { %v3871_v42 = vld [vmem:[%s4789_s30 + $0x3a4] ss:$16 sps:$4 sm:$0xff]   ;;  %v3874_v44 = vld [vmem:[%s4789_s30 + $0x3a0] ss:$16 sps:$4 sm:$0xff]   ;;  %v3940_v22 = vld [vmem:[%s4789_s30 + $0x26c] ss:$16 sps:$4 sm:$0xff]  }
  0xa7   : > { %1286 = vmatpush1.bf16.msra.mxu0 %v3843_v23  ;;  %v3875_v45 = vld [vmem:[%s4789_s30 + $0x184] ss:$16 sps:$4 sm:$0xff]   ;;  %v3879_v47 = vld [vmem:[%s4789_s30 + $0x180] ss:$16 sps:$4 sm:$0xff]   ;;  %v3935_v23 = vld [vmem:[%s4789_s30 + $0x68] ss:$16 sps:$4 sm:$0xff]  }
  0xa8   : > { %1329 = vmatpush1.bf16.msra.mxu1 %v3844_v24  ;;  %1287 = vmatprep.subr.bf16.mxu0 %v3845_v25  ;;  %v3877_v46 = vld [vmem:[%s4789_s30 + $0x384] ss:$16 sps:$4 sm:$0xff]   ;;  %v3880_v48 = vld [vmem:[%s4789_s30 + $0x380] ss:$16 sps:$4 sm:$0xff]   ;;  %v3938_v24 = vld [vmem:[%s4789_s30 + $0x268] ss:$16 sps:$4 sm:$0xff]  }
  0xa9   : > { %1330 = vmatprep.subr.bf16.mxu1 %v3847_v26  ;;  %v3881_v49 = vld [vmem:[%s4789_s30 + $0x164] ss:$16 sps:$4 sm:$0xff]   ;;  %v3885_v53 = vld [vmem:[%s4789_s30 + $0x160] ss:$16 sps:$4 sm:$0xff]   ;;  %v3943_v25 = vld [vmem:[%s4789_s30 + $0x4c] ss:$16 sps:$4 sm:$0xff]  }
  0xaa   : > { %v3907_v50 = vld [vmem:[%s4782_s7 + $0x4] ss:$16 sps:$4 sm:$0xff]   ;;  %v3886_v54 = vld [vmem:[%s4789_s30 + $0x360] ss:$16 sps:$4 sm:$0xff]   ;;  %v3946_v26 = vld [vmem:[%s4789_s30 + $0x24c] ss:$16 sps:$4 sm:$0xff]  }
  0xab   : > { %1288 = vmatpush1.bf16.msra.mxu0 %v3849_v27  ;;  %v3883_v51 = vld [vmem:[%s4789_s30 + $0x364] ss:$16 sps:$4 sm:$0xff]   ;;  %1307 = vmatprep.mubr.bf16.mxu0 %v3907_v50  ;;  %v3891_v57 = vld [vmem:[%s4789_s30 + $0x140] ss:$16 sps:$4 sm:$0xff]   ;;  %v3941_v27 = vld [vmem:[%s4789_s30 + $0x48] ss:$16 sps:$4 sm:$0xff]  }
  0xac   : > { %1331 = vmatpush1.bf16.msra.mxu1 %v3850_v28  ;;  %1289 = vmatprep.subr.bf16.mxu0 %v3851_v29  ;;  %v3887_v55 = vld [vmem:[%s4789_s30 + $0x144] ss:$16 sps:$4 sm:$0xff]   ;;  %v3892_v58 = vld [vmem:[%s4789_s30 + $0x340] ss:$16 sps:$4 sm:$0xff]   ;;  %v3944_v28 = vld [vmem:[%s4789_s30 + $0x248] ss:$16 sps:$4 sm:$0xff]  }
  0xad   : > { %1332 = vmatprep.subr.bf16.mxu1 %v3853_v30  ;;  %v3889_v56 = vld [vmem:[%s4789_s30 + $0x344] ss:$16 sps:$4 sm:$0xff]   ;;  %v3897_v61 = vld [vmem:[%s4789_s30 + $0x120] ss:$16 sps:$4 sm:$0xff]   ;;  %v3949_v29 = vld [vmem:[%s4789_s30 + $0x2c] ss:$16 sps:$4 sm:$0xff]  }
  0xae   : > { %v3893_v59 = vld [vmem:[%s4789_s30 + $0x124] ss:$16 sps:$4 sm:$0xff]   ;;  %v3898_v62 = vld [vmem:[%s4789_s30 + $0x320] ss:$16 sps:$4 sm:$0xff]   ;;  %v3952_v30 = vld [vmem:[%s4789_s30 + $0x22c] ss:$16 sps:$4 sm:$0xff]  }
  0xaf   : > { %1290 = vmatpush1.bf16.msra.mxu0 %v3855_v31  ;;  %v3895_v60 = vld [vmem:[%s4789_s30 + $0x324] ss:$16 sps:$4 sm:$0xff]   ;;  %v3903_v1 = vld [vmem:[%s4789_s30 + $0x100] ss:$16 sps:$4 sm:$0xff]   ;;  %v3947_v31 = vld [vmem:[%s4789_s30 + $0x28] ss:$16 sps:$4 sm:$0xff]  }
  0xb0   : > { %1333 = vmatpush1.bf16.msra.mxu1 %v3856_v32  ;;  %1291 = vmatprep.subr.bf16.mxu0 %v3857_v33  ;;  %v3899_v63 = vld [vmem:[%s4789_s30 + $0x104] ss:$16 sps:$4 sm:$0xff]   ;;  %v3904_v2 = vld [vmem:[%s4789_s30 + $0x300] ss:$16 sps:$4 sm:$0xff]   ;;  %v3950_v32 = vld [vmem:[%s4789_s30 + $0x228] ss:$16 sps:$4 sm:$0xff]  }
  0xb1   : > { %1334 = vmatprep.subr.bf16.mxu1 %v3859_v34  ;;  %v3901_v0 = vld [vmem:[%s4789_s30 + $0x304] ss:$16 sps:$4 sm:$0xff]   ;;  %v4877_v5 = vld [vmem:[%s4782_s7] ss:$16 sps:$4 sm:$0xff]   ;;  %v3955_v33 = vld [vmem:[%s4789_s30 + $0xc] ss:$16 sps:$4 sm:$0xff]  }
  0xb2   : > { %v3958_v34 = vld [vmem:[%s4789_s30 + $0x20c] ss:$16 sps:$4 sm:$0xff]  }
  0xb3   : > { %1292 = vmatpush2.bf16.msra.mxu0 %v3861_v35  ;;  %v3953_v35 = vld [vmem:[%s4789_s30 + $0x8] ss:$16 sps:$4 sm:$0xff]  }
  0xb4   : > { %1335 = vmatpush2.bf16.msra.mxu1 %v3862_v36  ;;  %1293 = vmatprep.subr.bf16.mxu0 %v3863_v37  ;;  %v3956_v36 = vld [vmem:[%s4789_s30 + $0x208] ss:$16 sps:$4 sm:$0xff]   ;;  %v3961_v37 = vld [vmem:[%s4789_s30 + $0x1ec] ss:$16 sps:$4 sm:$0xff]  }
  0xb5   : > { %1336 = vmatprep.subr.bf16.mxu1 %v3865_v38  ;;  %v3964_v38 = vld [vmem:[%s4789_s30 + $0x3ec] ss:$16 sps:$4 sm:$0xff]  }
  0xb7   : > { %1294 = vmatpush2.bf16.msra.mxu0 %v3867_v39  ;;  %v3959_v39 = vld [vmem:[%s4789_s30 + $0x1e8] ss:$16 sps:$4 sm:$0xff]  }
  0xb8   : > { %1337 = vmatpush2.bf16.msra.mxu1 %v3868_v40  ;;  %1295 = vmatprep.subr.bf16.mxu0 %v3869_v41  ;;  %v3962_v40 = vld [vmem:[%s4789_s30 + $0x3e8] ss:$16 sps:$4 sm:$0xff]   ;;  %v3967_v41 = vld [vmem:[%s4789_s30 + $0x1cc] ss:$16 sps:$4 sm:$0xff]  }
  0xb9   : > { %1338 = vmatprep.subr.bf16.mxu1 %v3871_v42  ;;  %v3970_v42 = vld [vmem:[%s4789_s30 + $0x3cc] ss:$16 sps:$4 sm:$0xff]  }
  0xbb   : > { %1296 = vmatpush2.bf16.msra.mxu0 %v3873_v43  ;;  %v3965_v43 = vld [vmem:[%s4789_s30 + $0x1c8] ss:$16 sps:$4 sm:$0xff]  }
  0xbc   : > { %1339 = vmatpush2.bf16.msra.mxu1 %v3874_v44  ;;  %1297 = vmatprep.subr.bf16.mxu0 %v3875_v45  ;;  %v3968_v44 = vld [vmem:[%s4789_s30 + $0x3c8] ss:$16 sps:$4 sm:$0xff]   ;;  %v3973_v45 = vld [vmem:[%s4789_s30 + $0x1ac] ss:$16 sps:$4 sm:$0xff]  }
  0xbd   : > { %1340 = vmatprep.subr.bf16.mxu1 %v3877_v46  ;;  %v3976_v46 = vld [vmem:[%s4789_s30 + $0x3ac] ss:$16 sps:$4 sm:$0xff]  }
  0xbf   : > { %1298 = vmatpush2.bf16.msra.mxu0 %v3879_v47  ;;  %v3971_v47 = vld [vmem:[%s4789_s30 + $0x1a8] ss:$16 sps:$4 sm:$0xff]  }
  0xc0   : > { %1341 = vmatpush2.bf16.msra.mxu1 %v3880_v48  ;;  %1299 = vmatprep.subr.bf16.mxu0 %v3881_v49  ;;  %v3974_v48 = vld [vmem:[%s4789_s30 + $0x3a8] ss:$16 sps:$4 sm:$0xff]   ;;  %v3979_v49 = vld [vmem:[%s4789_s30 + $0x18c] ss:$16 sps:$4 sm:$0xff]  }
  0xc1   : > { %1342 = vmatprep.subr.bf16.mxu1 %v3883_v51  ;;  %v3977_v51 = vld [vmem:[%s4789_s30 + $0x188] ss:$16 sps:$4 sm:$0xff]  }
  0xc3   : > { %1300 = vmatpush2.bf16.msra.mxu0 %v3885_v53  ;;  %v3985_v53 = vld [vmem:[%s4789_s30 + $0x16c] ss:$16 sps:$4 sm:$0xff]  }
  0xc4   : > { %1343 = vmatpush2.bf16.msra.mxu1 %v3886_v54  ;;  %1301 = vmatprep.subr.bf16.mxu0 %v3887_v55  ;;  %v3988_v54 = vld [vmem:[%s4789_s30 + $0x36c] ss:$16 sps:$4 sm:$0xff]   ;;  %v3983_v55 = vld [vmem:[%s4789_s30 + $0x168] ss:$16 sps:$4 sm:$0xff]  }
  0xc5   : > { %1344 = vmatprep.subr.bf16.mxu1 %v3889_v56  ;;  %v3986_v56 = vld [vmem:[%s4789_s30 + $0x368] ss:$16 sps:$4 sm:$0xff]  }
  0xc7   : > { %1302 = vmatpush2.bf16.msra.mxu0 %v3891_v57  ;;  %v3991_v57 = vld [vmem:[%s4789_s30 + $0x14c] ss:$16 sps:$4 sm:$0xff]  }
  0xc8   : > { %1345 = vmatpush2.bf16.msra.mxu1 %v3892_v58  ;;  %1303 = vmatprep.subr.bf16.mxu0 %v3893_v59  ;;  %v3994_v58 = vld [vmem:[%s4789_s30 + $0x34c] ss:$16 sps:$4 sm:$0xff]   ;;  %v3989_v59 = vld [vmem:[%s4789_s30 + $0x148] ss:$16 sps:$4 sm:$0xff]  }
  0xc9   : > { %1346 = vmatprep.subr.bf16.mxu1 %v3895_v60  ;;  %v3992_v60 = vld [vmem:[%s4789_s30 + $0x348] ss:$16 sps:$4 sm:$0xff]  }
  0xcb   : > { %1304 = vmatpush2.bf16.msra.mxu0 %v3897_v61  ;;  %v3997_v61 = vld [vmem:[%s4789_s30 + $0x12c] ss:$16 sps:$4 sm:$0xff]  }
  0xcc   : > { %1347 = vmatpush2.bf16.msra.mxu1 %v3898_v62  ;;  %1305 = vmatprep.subr.bf16.mxu0 %v3899_v63  ;;  %v4000_v62 = vld [vmem:[%s4789_s30 + $0x32c] ss:$16 sps:$4 sm:$0xff]   ;;  %v3995_v63 = vld [vmem:[%s4789_s30 + $0x128] ss:$16 sps:$4 sm:$0xff]  }
  0xcd   : > { %1348 = vmatprep.subr.bf16.mxu1 %v3901_v0  ;;  %v3998_v0 = vld [vmem:[%s4789_s30 + $0x328] ss:$16 sps:$4 sm:$0xff]  }
  0xcf   : > { %1306 = vmatpush2.bf16.msra.mxu0 %v3903_v1  ;;  %v4003_v1 = vld [vmem:[%s4789_s30 + $0x10c] ss:$16 sps:$4 sm:$0xff]  }
  0xd0   : > { %1349 = vmatpush2.bf16.msra.mxu1 %v3904_v2  ;;  %1361 = vmatprep.subr.bf16.mxu0 %v3913_v3  ;;  %v4006_v2 = vld [vmem:[%s4789_s30 + $0x30c] ss:$16 sps:$4 sm:$0xff]   ;;  %v4001_v3 = vld [vmem:[%s4789_s30 + $0x108] ss:$16 sps:$4 sm:$0xff]  }
  0xd1   : > { %1404 = vmatprep.subr.bf16.mxu1 %v3916_v4  ;;  %v4004_v4 = vld [vmem:[%s4789_s30 + $0x308] ss:$16 sps:$4 sm:$0xff]  }
  0xd2   : > { %1308 = vmatmul.mubr.bf16.vlgmr.msra.gmra.mxu0 %v4877_v5 }
  0xd3   : > { %1351 = vmatmul.mubr.bf16.vlgmr.msra.gmra.mxu1 %v4880_v6  ;;  %1362 = vmatpush1.bf16.msra.mxu0 %v3911_v7 }
  0xd4   : > { %1405 = vmatpush1.bf16.msra.mxu1 %v3914_v8  ;;  %1363 = vmatprep.subr.bf16.mxu0 %v3919_v9  ;;  %v475_v8 = vld [vmem:[#allocation2 + $0x30] sm:$0xff] }
  0xd5   : > { %1406 = vmatprep.subr.bf16.mxu1 %v3922_v10  ;;  %1393 = vmatprep.mubr.bf16.mxu0 %v3907_v50  ;;  %v3982_v50 = vld [vmem:[%s4789_s30 + $0x38c] ss:$16 sps:$4 sm:$0xff]  }
  0xd6   : > { %1436 = vmatprep.mubr.bf16.mxu1 %v3910_v52  ;;  %v3980_v52 = vld [vmem:[%s4789_s30 + $0x388] ss:$16 sps:$4 sm:$0xff]  }
  0xd7   : > { %1364 = vmatpush1.bf16.msra.mxu0 %v3917_v11 }
  0xd8   : > { %1407 = vmatpush1.bf16.msra.mxu1 %v3920_v12  ;;  %1365 = vmatprep.subr.bf16.mxu0 %v3925_v13  ;;  %v476_v12 = vld [vmem:[#allocation2] sm:$0xff] }
  0xd9   : > { %1408 = vmatprep.subr.bf16.mxu1 %v3928_v14 }
  0xdb   : > { %1366 = vmatpush1.bf16.msra.mxu0 %v3923_v15 }
  0xdc   : > { %1409 = vmatpush1.bf16.msra.mxu1 %v3926_v16  ;;  %1367 = vmatprep.subr.bf16.mxu0 %v3931_v17  ;;  %v479_v17 = vld [vmem:[#allocation2 + $0x8] sm:$0xff] }
  0xdd   : > { %1410 = vmatprep.subr.bf16.mxu1 %v3934_v18 }
  0xdf   : > { %1368 = vmatpush1.bf16.msra.mxu0 %v3929_v19 }
  0xe0   : > { %1411 = vmatpush1.bf16.msra.mxu1 %v3932_v20  ;;  %1369 = vmatprep.subr.bf16.mxu0 %v3937_v21 }
  0xe1   : > { %1412 = vmatprep.subr.bf16.mxu1 %v3940_v22  ;;  %v480_v22 = vld [vmem:[#allocation2 + $0x20] sm:$0xff] }
  0xe3   : > { %1370 = vmatpush1.bf16.msra.mxu0 %v3935_v23 }
  0xe4   : > { %1413 = vmatpush1.bf16.msra.mxu1 %v3938_v24  ;;  %1371 = vmatprep.subr.bf16.mxu0 %v3943_v25 }
  0xe5   : > { %1414 = vmatprep.subr.bf16.mxu1 %v3946_v26  ;;  %v477_v26 = vld [vmem:[#allocation2 + $0x18] sm:$0xff] }
  0xe7   : > { %1372 = vmatpush1.bf16.msra.mxu0 %v3941_v27 }
  0xe8   : > { %1415 = vmatpush1.bf16.msra.mxu1 %v3944_v28  ;;  %1373 = vmatprep.subr.bf16.mxu0 %v3949_v29 }
  0xe9   : > { %1416 = vmatprep.subr.bf16.mxu1 %v3952_v30  ;;  %v478_v30 = vld [vmem:[#allocation2 + $0x10] sm:$0xff] }
  0xeb   : > { %1374 = vmatpush1.bf16.msra.mxu0 %v3947_v31 }
  0xec   : > { %1417 = vmatpush1.bf16.msra.mxu1 %v3950_v32  ;;  %1375 = vmatprep.subr.bf16.mxu0 %v3955_v33 }
  0xed   : > { %1418 = vmatprep.subr.bf16.mxu1 %v3958_v34 }
  0xef   : > { %1376 = vmatpush1.bf16.msra.mxu0 %v3953_v35  ;;  %v481_v35 = vld [vmem:[#allocation2 + $0x28] sm:$0xff] }
  0xf0   : > { %1419 = vmatpush1.bf16.msra.mxu1 %v3956_v36  ;;  %1377 = vmatprep.subr.bf16.mxu0 %v3961_v37 }
  0xf1   : > { %1420 = vmatprep.subr.bf16.mxu1 %v3964_v38 }
  0xf3   : > { %1378 = vmatpush2.bf16.msra.mxu0 %v3959_v39 }
  0xf4   : > { %1421 = vmatpush2.bf16.msra.mxu1 %v3962_v40  ;;  %1379 = vmatprep.subr.bf16.mxu0 %v3967_v41  ;;  %v482_v40 = vld [vmem:[#allocation2 + $0x38] sm:$0xff] }
  0xf5   : > { %1422 = vmatprep.subr.bf16.mxu1 %v3970_v42 }
  0xf7   : > { %1380 = vmatpush2.bf16.msra.mxu0 %v3965_v43 }
  0xf8   : > { %1423 = vmatpush2.bf16.msra.mxu1 %v3968_v44  ;;  %1381 = vmatprep.subr.bf16.mxu0 %v3973_v45 }
  0xf9   : > { %1424 = vmatprep.subr.bf16.mxu1 %v3976_v46 }
  0xfb   : > { %1382 = vmatpush2.bf16.msra.mxu0 %v3971_v47 }
  0xfc   : > { %1425 = vmatpush2.bf16.msra.mxu1 %v3974_v48  ;;  %1383 = vmatprep.subr.bf16.mxu0 %v3979_v49 }
  0xfd   : > { %1426 = vmatprep.subr.bf16.mxu1 %v3982_v50 }
  0xff   : > { %1384 = vmatpush2.bf16.msra.mxu0 %v3977_v51 }
 0x100   : > { %1427 = vmatpush2.bf16.msra.mxu1 %v3980_v52  ;;  %1385 = vmatprep.subr.bf16.mxu0 %v3985_v53 }
 0x101   : > { %1428 = vmatprep.subr.bf16.mxu1 %v3988_v54 }
 0x103   : > { %1386 = vmatpush2.bf16.msra.mxu0 %v3983_v55 }
 0x104   : > { %1429 = vmatpush2.bf16.msra.mxu1 %v3986_v56  ;;  %1387 = vmatprep.subr.bf16.mxu0 %v3991_v57 }
 0x105   : > { %1430 = vmatprep.subr.bf16.mxu1 %v3994_v58 }
 0x107   : > { %1388 = vmatpush2.bf16.msra.mxu0 %v3989_v59 }
 0x108   : > { %1431 = vmatpush2.bf16.msra.mxu1 %v3992_v60  ;;  %1389 = vmatprep.subr.bf16.mxu0 %v3997_v61 }
 0x109   : > { %1432 = vmatprep.subr.bf16.mxu1 %v4000_v62 }
 0x10b   : > { %1390 = vmatpush2.bf16.msra.mxu0 %v3995_v63 }
 0x10c   : > { %1433 = vmatpush2.bf16.msra.mxu1 %v3998_v0  ;;  %1391 = vmatprep.subr.bf16.mxu0 %v4003_v1 }
 0x10d   : > { %1434 = vmatprep.subr.bf16.mxu1 %v4006_v2 }
 0x10f   : > { %1392 = vmatpush2.bf16.msra.mxu0 %v4001_v3 }
 0x110   : > { %1435 = vmatpush2.bf16.msra.mxu1 %v4004_v4 }
 0x112   : > { %1394 = vmatmul.mubr.bf16.vlgmr.msra.gmra.mxu0 %v4877_v5 }
 0x113   : > { %1437 = vmatmul.mubr.bf16.vlgmr.msra.gmra.mxu1 %v4880_v6 }
 0x192   : > { %v1309_v7 = vpop.f32.mrf.mxu0 }
 0x193   : > { %v1352_v9 = vpop.f32.mrf.mxu1 }
 0x194   : > { %v1353_v10 = vadd.f32 %v1352_v9, %v1309_v7  ;;  %v1311_v11 = vpop.f32.mrf.mxu0 }
 0x195   : > { %v1354_v13 = vpop.f32.mrf.mxu1 }
 0x196   : > { %v1447_v14 = vadd.f32 %v1353_v10, %v475_v8  ;;  %v1355_v15 = vadd.f32 %v1354_v13, %v1311_v11  ;;  %v1313_v16 = vpop.f32.mrf.mxu0 }
 0x197   : > { %v1356_v18 = vpop.f32.mrf.mxu1 }
 0x198   : > { %1455 = vst [vmem:[#allocation2 + $0x30] sm:$0xff] %v1447_v14  ;;  %v1448_v19 = vadd.f32 %v1355_v15, %v476_v12  ;;  %v1357_v20 = vadd.f32 %v1356_v18, %v1313_v16  ;;  %v1315_v21 = vpop.f32.mrf.mxu0 }
 0x199   : > { %v1358_v5 = vpop.f32.mrf.mxu1 }
 0x19a   : > { %1456 = vst [vmem:[#allocation2] sm:$0xff] %v1448_v19  ;;  %v1451_v6 = vadd.f32 %v1357_v20, %v479_v17  ;;  %v1359_v23 = vadd.f32 %v1358_v5, %v1315_v21 }
 0x19c   : > { %1459 = vst [vmem:[#allocation2 + $0x8] sm:$0xff] %v1451_v6  ;;  %v1452_v24 = vadd.f32 %v1359_v23, %v480_v22 }
 0x19e   : > { %1460 = vst [vmem:[#allocation2 + $0x20] sm:$0xff] %v1452_v24 }
 0x1d2   : > { %v1395_v25 = vpop.f32.mrf.mxu0 }
 0x1d3   : > { %v1438_v27 = vpop.f32.mrf.mxu1 }
 0x1d4   : > { %v1439_v28 = vadd.f32 %v1438_v27, %v1395_v25  ;;  %v1397_v29 = vpop.f32.mrf.mxu0 }
 0x1d5   : > { %v1440_v31 = vpop.f32.mrf.mxu1 }
 0x1d6   : > { %v1449_v32 = vadd.f32 %v1439_v28, %v477_v26  ;;  %v1441_v33 = vadd.f32 %v1440_v31, %v1397_v29  ;;  %v1399_v34 = vpop.f32.mrf.mxu0 }
 0x1d7   : > { %v1442_v36 = vpop.f32.mrf.mxu1 }
 0x1d8   : > { %1457 = vst [vmem:[#allocation2 + $0x18] sm:$0xff] %v1449_v32  ;;  %v1450_v37 = vadd.f32 %v1441_v33, %v478_v30  ;;  %v1443_v38 = vadd.f32 %v1442_v36, %v1399_v34  ;;  %v1401_v39 = vpop.f32.mrf.mxu0 }
 0x1d9   : > { %v1444_v41 = vpop.f32.mrf.mxu1 }
 0x1da   : > { %1458 = vst [vmem:[#allocation2 + $0x10] sm:$0xff] %v1450_v37  ;;  %v1453_v42 = vadd.f32 %v1443_v38, %v481_v35  ;;  %v1445_v43 = vadd.f32 %v1444_v41, %v1401_v39  ;;  %1466 = sbr.rel (%p3452_p5) target bundleno = 1384 (0x568), region = 88 }
 0x1dc   : > { %1461 = vst [vmem:[#allocation2 + $0x28] sm:$0xff] %v1453_v42  ;;  %v1454_v44 = vadd.f32 %v1445_v43, %v482_v40 }
 0x1de   : > { %1462 = vst [vmem:[#allocation2 + $0x38] sm:$0xff] %v1454_v44 }
 0x1df   : > { %v4007_v45 = vld [vmem:[#allocation9 + $0xe4] ss:$16 sps:$4 sm:$0xff]   ;;  %v4011_v47 = vld [vmem:[#allocation9 + $0xe0] ss:$16 sps:$4 sm:$0xff]   ;;  %v1477_v20 = vlaneseq  ;;  %v1475_v33 = vld [vmem:[#allocation8] sm:$0xf] }
 0x1e0   : > { %v4009_v46 = vld [vmem:[#allocation9 + $0x2e4] ss:$16 sps:$4 sm:$0xff]   ;;  %2299 = vmatprep.subr.bf16.mxu0 %v4007_v45  ;;  %v4012_v48 = vld [vmem:[#allocation9 + $0x2e0] ss:$16 sps:$4 sm:$0xff]  }
 0x1e1   : > { %2342 = vmatprep.subr.bf16.mxu1 %v4009_v46  ;;  %v4013_v49 = vld [vmem:[#allocation9 + $0xc4] ss:$16 sps:$4 sm:$0xff]   ;;  %2300 = vmatpush1.bf16.msra.mxu0 %v4011_v47  ;;  %v4017_v51 = vld [vmem:[#allocation9 + $0xc0] ss:$16 sps:$4 sm:$0xff]   ;;  %v4949_v23 = vshrl.u32 %v1477_v20, 7 }
 0x1e2   : > { %2343 = vmatpush1.bf16.msra.mxu1 %v4012_v48  ;;  %v4015_v50 = vld [vmem:[#allocation9 + $0x2c4] ss:$16 sps:$4 sm:$0xff]   ;;  %2301 = vmatprep.subr.bf16.mxu0 %v4013_v49  ;;  %v4018_v52 = vld [vmem:[#allocation9 + $0x2c0] ss:$16 sps:$4 sm:$0xff]   ;;  %v4109_v20 = vld [vmem:[#allocation9 + $0xc8] ss:$16 sps:$4 sm:$0xff]  }
 0x1e3   : > { %2344 = vmatprep.subr.bf16.mxu1 %v4015_v50  ;;  %v4019_v53 = vld [vmem:[#allocation9 + $0xa4] ss:$16 sps:$4 sm:$0xff]   ;;  %v4023_v55 = vld [vmem:[#allocation9 + $0xa0] ss:$16 sps:$4 sm:$0xff]   ;;  %v4952_v28 = vsub.s32 1, %v4949_v23  ;;  %v1491_v29 = vsub.s32 3, %v4949_v23 }
 0x1e4   : > { %v4021_v54 = vld [vmem:[#allocation9 + $0x2a4] ss:$16 sps:$4 sm:$0xff]   ;;  %v4024_v56 = vld [vmem:[#allocation9 + $0x2a0] ss:$16 sps:$4 sm:$0xff]  }
 0x1e5   : > { %2302 = vmatpush1.bf16.msra.mxu0 %v4017_v51  ;;  %v4025_v57 = vld [vmem:[#allocation9 + $0x84] ss:$16 sps:$4 sm:$0xff]   ;;  %v4029_v59 = vld [vmem:[#allocation9 + $0x80] ss:$16 sps:$4 sm:$0xff]   ;;  %v1484_v37 = vrot.slane %v1475_v33, %v4952_v28  ;;  %v1492_v39 = vrot.slane %v1475_v33, %v1491_v29 }
 0x1e6   : > { %2345 = vmatpush1.bf16.msra.mxu1 %v4018_v52  ;;  %2303 = vmatprep.subr.bf16.mxu0 %v4019_v53  ;;  %v4027_v58 = vld [vmem:[#allocation9 + $0x284] ss:$16 sps:$4 sm:$0xff]   ;;  %v4030_v60 = vld [vmem:[#allocation9 + $0x280] ss:$16 sps:$4 sm:$0xff]   ;;  %v4965_v53 = vsub.s32 0, %v4949_v23 }
 0x1e7   : > { %2346 = vmatprep.subr.bf16.mxu1 %v4021_v54  ;;  %v4031_v61 = vld [vmem:[#allocation9 + $0x64] ss:$16 sps:$4 sm:$0xff]   ;;  %v4035_v63 = vld [vmem:[#allocation9 + $0x60] ss:$16 sps:$4 sm:$0xff]   ;;  %v1487_v54 = vsub.s32 2, %v4949_v23 }
 0x1e8   : > { %v4033_v62 = vld [vmem:[#allocation9 + $0x264] ss:$16 sps:$4 sm:$0xff]   ;;  %v4036_v0 = vld [vmem:[#allocation9 + $0x260] ss:$16 sps:$4 sm:$0xff]  }
 0x1e9   : > { %2304 = vmatpush1.bf16.msra.mxu0 %v4023_v55  ;;  %v4037_v1 = vld [vmem:[#allocation9 + $0x44] ss:$16 sps:$4 sm:$0xff]   ;;  %v4041_v3 = vld [vmem:[#allocation9 + $0x40] ss:$16 sps:$4 sm:$0xff]  }
 0x1ea   : > { %2347 = vmatpush1.bf16.msra.mxu1 %v4024_v56  ;;  %2305 = vmatprep.subr.bf16.mxu0 %v4025_v57  ;;  %v4039_v2 = vld [vmem:[#allocation9 + $0x244] ss:$16 sps:$4 sm:$0xff]   ;;  %v4042_v4 = vld [vmem:[#allocation9 + $0x240] ss:$16 sps:$4 sm:$0xff]  }
 0x1eb   : > { %2348 = vmatprep.subr.bf16.mxu1 %v4027_v58  ;;  %v4043_v7 = vld [vmem:[#allocation9 + $0x24] ss:$16 sps:$4 sm:$0xff]   ;;  %v4047_v9 = vld [vmem:[#allocation9 + $0x20] ss:$16 sps:$4 sm:$0xff]  }
 0x1ec   : > { %v4045_v8 = vld [vmem:[#allocation9 + $0x224] ss:$16 sps:$4 sm:$0xff]   ;;  %v4048_v10 = vld [vmem:[#allocation9 + $0x220] ss:$16 sps:$4 sm:$0xff]  }
 0x1ed   : > { %2306 = vmatpush1.bf16.msra.mxu0 %v4029_v59  ;;  %v4049_v11 = vld [vmem:[#allocation9 + $0x4] ss:$16 sps:$4 sm:$0xff]   ;;  %v4053_v13 = vld [vmem:[#allocation9] ss:$16 sps:$4 sm:$0xff]  }
 0x1ee   : > { %2349 = vmatpush1.bf16.msra.mxu1 %v4030_v60  ;;  %2307 = vmatprep.subr.bf16.mxu0 %v4031_v61  ;;  %v4051_v12 = vld [vmem:[#allocation9 + $0x204] ss:$16 sps:$4 sm:$0xff]   ;;  %v4054_v14 = vld [vmem:[#allocation9 + $0x200] ss:$16 sps:$4 sm:$0xff]  }
 0x1ef   : > { %2350 = vmatprep.subr.bf16.mxu1 %v4033_v62  ;;  %v4055_v15 = vld [vmem:[#allocation9 + $0x1e4] ss:$16 sps:$4 sm:$0xff]   ;;  %v4059_v17 = vld [vmem:[#allocation9 + $0x1e0] ss:$16 sps:$4 sm:$0xff]   ;;  %v1480_v62 = vrot.slane %v1475_v33, %v4965_v53 }
 0x1f0   : > { %v4057_v16 = vld [vmem:[#allocation9 + $0x3e4] ss:$16 sps:$4 sm:$0xff]   ;;  %v4060_v18 = vld [vmem:[#allocation9 + $0x3e0] ss:$16 sps:$4 sm:$0xff]  }
 0x1f1   : > { %2308 = vmatpush1.bf16.msra.mxu0 %v4035_v63  ;;  %v4061_v19 = vld [vmem:[#allocation9 + $0x1c4] ss:$16 sps:$4 sm:$0xff]   ;;  %v4065_v22 = vld [vmem:[#allocation9 + $0x1c0] ss:$16 sps:$4 sm:$0xff]  }
 0x1f2   : > { %2351 = vmatpush1.bf16.msra.mxu1 %v4036_v0  ;;  %2309 = vmatprep.subr.bf16.mxu0 %v4037_v1  ;;  %v4063_v21 = vld [vmem:[#allocation9 + $0x3c4] ss:$16 sps:$4 sm:$0xff]   ;;  %v4066_v5 = vld [vmem:[#allocation9 + $0x3c0] ss:$16 sps:$4 sm:$0xff]   ;;  %v1488_v0 = vrot.slane %v1475_v33, %v1487_v54  ;;  %v4127_v33 = vld [vmem:[#allocation9 + $0x68] ss:$16 sps:$4 sm:$0xff]  }
 0x1f3   : > { %2352 = vmatprep.subr.bf16.mxu1 %v4039_v2  ;;  %v4067_v6 = vld [vmem:[#allocation9 + $0x1a4] ss:$16 sps:$4 sm:$0xff]   ;;  %v4071_v25 = vld [vmem:[#allocation9 + $0x1a0] ss:$16 sps:$4 sm:$0xff]  }
 0x1f4   : > { %v4069_v24 = vld [vmem:[#allocation9 + $0x3a4] ss:$16 sps:$4 sm:$0xff]   ;;  %v4072_v26 = vld [vmem:[#allocation9 + $0x3a0] ss:$16 sps:$4 sm:$0xff]  }
 0x1f5   : > { %2310 = vmatpush1.bf16.msra.mxu0 %v4041_v3  ;;  %v4073_v27 = vld [vmem:[#allocation9 + $0x184] ss:$16 sps:$4 sm:$0xff]   ;;  %v1468_v31 = vld [vmem:[#allocation2] sm:$0xff]  ;;  %v1470_v34 = vld [vmem:[#allocation2 + $0x10] sm:$0xff] }
 0x1f6   : > { %2353 = vmatpush1.bf16.msra.mxu1 %v4042_v4  ;;  %2311 = vmatprep.subr.bf16.mxu0 %v4043_v7  ;;  %v4075_v30 = vld [vmem:[#allocation9 + $0x384] ss:$16 sps:$4 sm:$0xff]   ;;  %v1472_v32 = vld [vmem:[#allocation2 + $0x20] sm:$0xff]  ;;  %v1498_v42 = vadd.f32 %v1484_v37, %v1468_v31  ;;  %v1500_v44 = vadd.f32 %v1492_v39, %v1470_v34  ;;  %v1467_v60 = vld [vmem:[#allocation2 + $0x30] sm:$0xff] }
 0x1f7   : > { %2354 = vmatprep.subr.bf16.mxu1 %v4045_v8  ;;  %v4077_v35 = vld [vmem:[#allocation9 + $0x180] ss:$16 sps:$4 sm:$0xff]   ;;  %v1474_v38 = vld [vmem:[#allocation2 + $0x38] sm:$0xff]  ;;  %v1502_v43 = vadd.f32 %v1484_v37, %v1472_v32  ;;  %v1471_v61 = vld [vmem:[#allocation2 + $0x8] sm:$0xff]  ;;  %v1497_v7 = vadd.f32 %v1480_v62, %v1467_v60 }
 0x1f8   : > { %v4078_v36 = vld [vmem:[#allocation9 + $0x380] ss:$16 sps:$4 sm:$0xff]   ;;  %v4079_v40 = vld [vmem:[#allocation9 + $0x164] ss:$16 sps:$4 sm:$0xff]   ;;  %v1504_v45 = vadd.f32 %v1492_v39, %v1474_v38  ;;  %v1501_v8 = vadd.f32 %v1480_v62, %v1471_v61  ;;  %v4129_v31 = vld [vmem:[#allocation9 + $0x6c] ss:$16 sps:$4 sm:$0xff]  }
 0x1f9   : > { %2312 = vmatpush1.bf16.msra.mxu0 %v4047_v9  ;;  %v4081_v41 = vld [vmem:[#allocation9 + $0x364] ss:$16 sps:$4 sm:$0xff]   ;;  %v4083_v46 = vld [vmem:[#allocation9 + $0x160] ss:$16 sps:$4 sm:$0xff]   ;;  %v4958_v48 = vpack.c.bf16 %v1502_v43, %v1498_v42  ;;  %v4132_v32 = vld [vmem:[#allocation9 + $0x26c] ss:$16 sps:$4 sm:$0xff]  }
 0x1fa   : > { %2355 = vmatpush1.bf16.msra.mxu1 %v4048_v10  ;;  %2313 = vmatprep.subr.bf16.mxu0 %v4049_v11  ;;  %v4084_v47 = vld [vmem:[#allocation9 + $0x360] ss:$16 sps:$4 sm:$0xff]   ;;  %v4960_v49 = vpack.c.bf16 %v1504_v45, %v1500_v44  ;;  %v4085_v50 = vld [vmem:[#allocation9 + $0x144] ss:$16 sps:$4 sm:$0xff]   ;;  %v4130_v34 = vld [vmem:[#allocation9 + $0x268] ss:$16 sps:$4 sm:$0xff]  }
 0x1fb   : > { %2356 = vmatprep.subr.bf16.mxu1 %v4051_v12  ;;  %v4087_v51 = vld [vmem:[#allocation9 + $0x344] ss:$16 sps:$4 sm:$0xff]   ;;  %2331 = vmatprep.mubr.bf16.mxu0 %v4958_v48  ;;  %v4089_v52 = vld [vmem:[#allocation9 + $0x140] ss:$16 sps:$4 sm:$0xff]   ;;  %v4105_v12 = vld [vmem:[#allocation9 + $0xec] ss:$16 sps:$4 sm:$0xff]  }
 0x1fc   : > { %2374 = vmatprep.mubr.bf16.mxu1 %v4960_v49  ;;  %v4090_v55 = vld [vmem:[#allocation9 + $0x340] ss:$16 sps:$4 sm:$0xff]   ;;  %v4091_v56 = vld [vmem:[#allocation9 + $0x124] ss:$16 sps:$4 sm:$0xff]   ;;  %v4133_v37 = vld [vmem:[#allocation9 + $0x48] ss:$16 sps:$4 sm:$0xff]  }
 0x1fd   : > { %2314 = vmatpush1.bf16.msra.mxu0 %v4053_v13  ;;  %v4093_v57 = vld [vmem:[#allocation9 + $0x324] ss:$16 sps:$4 sm:$0xff]   ;;  %v4095_v58 = vld [vmem:[#allocation9 + $0x120] ss:$16 sps:$4 sm:$0xff]   ;;  %v4108_v13 = vld [vmem:[#allocation9 + $0x2ec] ss:$16 sps:$4 sm:$0xff]  }
 0x1fe   : > { %2357 = vmatpush1.bf16.msra.mxu1 %v4054_v14  ;;  %2315 = vmatprep.subr.bf16.mxu0 %v4055_v15  ;;  %v4096_v59 = vld [vmem:[#allocation9 + $0x320] ss:$16 sps:$4 sm:$0xff]   ;;  %v1469_v63 = vld [vmem:[#allocation2 + $0x18] sm:$0xff]  ;;  %v1473_v1 = vld [vmem:[#allocation2 + $0x28] sm:$0xff]  ;;  %v4971_v14 = vpack.c.bf16 %v1501_v8, %v1497_v7 }
 0x1ff   : > { %2358 = vmatprep.subr.bf16.mxu1 %v4057_v16  ;;  %v4097_v2 = vld [vmem:[#allocation9 + $0x104] ss:$16 sps:$4 sm:$0xff]   ;;  %v4101_v4 = vld [vmem:[#allocation9 + $0x100] ss:$16 sps:$4 sm:$0xff]   ;;  %v1499_v9 = vadd.f32 %v1488_v0, %v1469_v63  ;;  %v1503_v10 = vadd.f32 %v1488_v0, %v1473_v1  ;;  %v4103_v16 = vld [vmem:[#allocation9 + $0xe8] ss:$16 sps:$4 sm:$0xff]  }
 0x200   : > { %v4099_v3 = vld [vmem:[#allocation9 + $0x304] ss:$16 sps:$4 sm:$0xff]   ;;  %v4102_v11 = vld [vmem:[#allocation9 + $0x300] ss:$16 sps:$4 sm:$0xff]   ;;  %v4136_v38 = vld [vmem:[#allocation9 + $0x248] ss:$16 sps:$4 sm:$0xff]  }
 0x201   : > { %2316 = vmatpush2.bf16.msra.mxu0 %v4059_v17  ;;  %v4973_v15 = vpack.c.bf16 %v1503_v10, %v1499_v9  ;;  %v4106_v17 = vld [vmem:[#allocation9 + $0x2e8] ss:$16 sps:$4 sm:$0xff]   ;;  %v4141_v39 = vld [vmem:[#allocation9 + $0x2c] ss:$16 sps:$4 sm:$0xff]  }
 0x202   : > { %2359 = vmatpush2.bf16.msra.mxu1 %v4060_v18  ;;  %2317 = vmatprep.subr.bf16.mxu0 %v4061_v19  ;;  %v4111_v18 = vld [vmem:[#allocation9 + $0xcc] ss:$16 sps:$4 sm:$0xff]   ;;  %v4142_v42 = vld [vmem:[#allocation9 + $0x228] ss:$16 sps:$4 sm:$0xff]  }
 0x203   : > { %2360 = vmatprep.subr.bf16.mxu1 %v4063_v21  ;;  %v4114_v19 = vld [vmem:[#allocation9 + $0x2cc] ss:$16 sps:$4 sm:$0xff]   ;;  %v4112_v21 = vld [vmem:[#allocation9 + $0x2c8] ss:$16 sps:$4 sm:$0xff]  }
 0x204   : > { %v4147_v43 = vld [vmem:[#allocation9 + $0xc] ss:$16 sps:$4 sm:$0xff]   ;;  %v4145_v45 = vld [vmem:[#allocation9 + $0x8] ss:$16 sps:$4 sm:$0xff]  }
 0x205   : > { %2318 = vmatpush2.bf16.msra.mxu0 %v4065_v22  ;;  %v4117_v22 = vld [vmem:[#allocation9 + $0xac] ss:$16 sps:$4 sm:$0xff]   ;;  %v4166_v60 = vld [vmem:[#allocation9 + $0x3a8] ss:$16 sps:$4 sm:$0xff]  }
 0x206   : > { %2361 = vmatpush2.bf16.msra.mxu1 %v4066_v5  ;;  %2319 = vmatprep.subr.bf16.mxu0 %v4067_v6  ;;  %v4120_v5 = vld [vmem:[#allocation9 + $0x2ac] ss:$16 sps:$4 sm:$0xff]   ;;  %v4115_v6 = vld [vmem:[#allocation9 + $0xa8] ss:$16 sps:$4 sm:$0xff]  }
 0x207   : > { %2362 = vmatprep.subr.bf16.mxu1 %v4069_v24  ;;  %v4118_v24 = vld [vmem:[#allocation9 + $0x2a8] ss:$16 sps:$4 sm:$0xff]   ;;  %v4150_v44 = vld [vmem:[#allocation9 + $0x20c] ss:$16 sps:$4 sm:$0xff]  }
 0x208   : > { %v4171_v61 = vld [vmem:[#allocation9 + $0x18c] ss:$16 sps:$4 sm:$0xff]   ;;  %v4169_v63 = vld [vmem:[#allocation9 + $0x188] ss:$16 sps:$4 sm:$0xff]  }
 0x209   : > { %2320 = vmatpush2.bf16.msra.mxu0 %v4071_v25  ;;  %v4123_v25 = vld [vmem:[#allocation9 + $0x8c] ss:$16 sps:$4 sm:$0xff]   ;;  %v4172_v0 = vld [vmem:[#allocation9 + $0x388] ss:$16 sps:$4 sm:$0xff]  }
 0x20a   : > { %2363 = vmatpush2.bf16.msra.mxu1 %v4072_v26  ;;  %2321 = vmatprep.subr.bf16.mxu0 %v4073_v27  ;;  %v4126_v26 = vld [vmem:[#allocation9 + $0x28c] ss:$16 sps:$4 sm:$0xff]   ;;  %v4121_v27 = vld [vmem:[#allocation9 + $0x88] ss:$16 sps:$4 sm:$0xff]  }
 0x20b   : > { %2364 = vmatprep.subr.bf16.mxu1 %v4075_v30  ;;  %v4124_v30 = vld [vmem:[#allocation9 + $0x288] ss:$16 sps:$4 sm:$0xff]   ;;  %v4174_v62 = vld [vmem:[#allocation9 + $0x38c] ss:$16 sps:$4 sm:$0xff]  }
 0x20c   : > { %v4177_v1 = vld [vmem:[#allocation9 + $0x16c] ss:$16 sps:$4 sm:$0xff]   ;;  %v4181_v9 = vld [vmem:[#allocation9 + $0x148] ss:$16 sps:$4 sm:$0xff]  }
 0x20d   : > { %2322 = vmatpush2.bf16.msra.mxu0 %v4077_v35  ;;  %v4135_v35 = vld [vmem:[#allocation9 + $0x4c] ss:$16 sps:$4 sm:$0xff]   ;;  %v4184_v10 = vld [vmem:[#allocation9 + $0x348] ss:$16 sps:$4 sm:$0xff]  }
 0x20e   : > { %2365 = vmatpush2.bf16.msra.mxu1 %v4078_v36  ;;  %2323 = vmatprep.subr.bf16.mxu0 %v4079_v40  ;;  %v4138_v36 = vld [vmem:[#allocation9 + $0x24c] ss:$16 sps:$4 sm:$0xff]  }
 0x20f   : > { %2366 = vmatprep.subr.bf16.mxu1 %v4081_v41  ;;  %v4144_v40 = vld [vmem:[#allocation9 + $0x22c] ss:$16 sps:$4 sm:$0xff]   ;;  %v4139_v41 = vld [vmem:[#allocation9 + $0x28] ss:$16 sps:$4 sm:$0xff]  }
 0x210   : > { %v4183_v7 = vld [vmem:[#allocation9 + $0x14c] ss:$16 sps:$4 sm:$0xff]  }
 0x211   : > { %2324 = vmatpush2.bf16.msra.mxu0 %v4083_v46  ;;  %v4148_v46 = vld [vmem:[#allocation9 + $0x208] ss:$16 sps:$4 sm:$0xff]   ;;  %v4186_v8 = vld [vmem:[#allocation9 + $0x34c] ss:$16 sps:$4 sm:$0xff]  }
 0x212   : > { %2367 = vmatpush2.bf16.msra.mxu1 %v4084_v47  ;;  %2325 = vmatprep.subr.bf16.mxu0 %v4085_v50  ;;  %v4153_v47 = vld [vmem:[#allocation9 + $0x1ec] ss:$16 sps:$4 sm:$0xff]   ;;  %v4154_v50 = vld [vmem:[#allocation9 + $0x3e8] ss:$16 sps:$4 sm:$0xff]  }
 0x213   : > { %2368 = vmatprep.subr.bf16.mxu1 %v4087_v51  ;;  %v4159_v51 = vld [vmem:[#allocation9 + $0x1cc] ss:$16 sps:$4 sm:$0xff]  }
 0x215   : > { %2326 = vmatpush2.bf16.msra.mxu0 %v4089_v52  ;;  %v4162_v52 = vld [vmem:[#allocation9 + $0x3cc] ss:$16 sps:$4 sm:$0xff]  }
 0x216   : > { %2369 = vmatpush2.bf16.msra.mxu1 %v4090_v55  ;;  %2327 = vmatprep.subr.bf16.mxu0 %v4091_v56  ;;  %v4157_v55 = vld [vmem:[#allocation9 + $0x1c8] ss:$16 sps:$4 sm:$0xff]  }
 0x217   : > { %2370 = vmatprep.subr.bf16.mxu1 %v4093_v57  ;;  %v4160_v56 = vld [vmem:[#allocation9 + $0x3c8] ss:$16 sps:$4 sm:$0xff]   ;;  %v4165_v57 = vld [vmem:[#allocation9 + $0x1ac] ss:$16 sps:$4 sm:$0xff]  }
 0x219   : > { %2328 = vmatpush2.bf16.msra.mxu0 %v4095_v58  ;;  %v4168_v58 = vld [vmem:[#allocation9 + $0x3ac] ss:$16 sps:$4 sm:$0xff]  }
 0x21a   : > { %2371 = vmatpush2.bf16.msra.mxu1 %v4096_v59  ;;  %2329 = vmatprep.subr.bf16.mxu0 %v4097_v2  ;;  %v4163_v59 = vld [vmem:[#allocation9 + $0x1a8] ss:$16 sps:$4 sm:$0xff]   ;;  %v4180_v2 = vld [vmem:[#allocation9 + $0x36c] ss:$16 sps:$4 sm:$0xff]  }
 0x21b   : > { %2372 = vmatprep.subr.bf16.mxu1 %v4099_v3  ;;  %v4175_v3 = vld [vmem:[#allocation9 + $0x168] ss:$16 sps:$4 sm:$0xff]  }
 0x21d   : > { %2330 = vmatpush2.bf16.msra.mxu0 %v4101_v4  ;;  %v4178_v4 = vld [vmem:[#allocation9 + $0x368] ss:$16 sps:$4 sm:$0xff]  }
 0x21e   : > { %2373 = vmatpush2.bf16.msra.mxu1 %v4102_v11  ;;  %2385 = vmatprep.subr.bf16.mxu0 %v4105_v12  ;;  %v4189_v11 = vld [vmem:[#allocation9 + $0x12c] ss:$16 sps:$4 sm:$0xff]  }
 0x21f   : > { %2428 = vmatprep.subr.bf16.mxu1 %v4108_v13  ;;  %v4192_v12 = vld [vmem:[#allocation9 + $0x32c] ss:$16 sps:$4 sm:$0xff]   ;;  %v4187_v13 = vld [vmem:[#allocation9 + $0x128] ss:$16 sps:$4 sm:$0xff]  }
 0x220   : > { %2332 = vmatmul.mubr.bf16.vlgmr.msra.gmra.mxu0 %v4971_v14 }
 0x221   : > { %2375 = vmatmul.mubr.bf16.vlgmr.msra.gmra.mxu1 %v4973_v15  ;;  %2386 = vmatpush1.bf16.msra.mxu0 %v4103_v16  ;;  %v4190_v16 = vld [vmem:[#allocation9 + $0x328] ss:$16 sps:$4 sm:$0xff]  }
 0x222   : > { %2429 = vmatpush1.bf16.msra.mxu1 %v4106_v17  ;;  %2387 = vmatprep.subr.bf16.mxu0 %v4111_v18  ;;  %v4195_v17 = vld [vmem:[#allocation9 + $0x10c] ss:$16 sps:$4 sm:$0xff]  }
 0x223   : > { %2430 = vmatprep.subr.bf16.mxu1 %v4114_v19  ;;  %2417 = vmatprep.mubr.bf16.mxu0 %v4958_v48  ;;  %v4156_v48 = vld [vmem:[#allocation9 + $0x3ec] ss:$16 sps:$4 sm:$0xff]   ;;  %v4193_v19 = vld [vmem:[#allocation9 + $0x108] ss:$16 sps:$4 sm:$0xff]  }
 0x224   : > { %2460 = vmatprep.mubr.bf16.mxu1 %v4960_v49  ;;  %v4151_v49 = vld [vmem:[#allocation9 + $0x1e8] ss:$16 sps:$4 sm:$0xff]   ;;  %v4198_v18 = vld [vmem:[#allocation9 + $0x30c] ss:$16 sps:$4 sm:$0xff]  }
 0x225   : > { %2388 = vmatpush1.bf16.msra.mxu0 %v4109_v20  ;;  %v4196_v20 = vld [vmem:[#allocation9 + $0x308] ss:$16 sps:$4 sm:$0xff]  }
 0x226   : > { %2431 = vmatpush1.bf16.msra.mxu1 %v4112_v21  ;;  %2389 = vmatprep.subr.bf16.mxu0 %v4117_v22  ;;  %v4201_v21 = vld [vmem:[#allocation11 + $0x74] ss:$8 sps:$4 sm:$0xff]   ;;  %v4199_v22 = vld [vmem:[#allocation11 + $0x70] ss:$8 sps:$4 sm:$0xff]  }
 0x227   : > { %2432 = vmatprep.subr.bf16.mxu1 %v4120_v5  ;;  %v4204_v5 = vld [vmem:[#allocation11 + $0x64] ss:$8 sps:$4 sm:$0xff]  }
 0x229   : > { %2390 = vmatpush1.bf16.msra.mxu0 %v4115_v6  ;;  %v4202_v6 = vld [vmem:[#allocation11 + $0x60] ss:$8 sps:$4 sm:$0xff]  }
 0x22a   : > { %2433 = vmatpush1.bf16.msra.mxu1 %v4118_v24  ;;  %2391 = vmatprep.subr.bf16.mxu0 %v4123_v25  ;;  %v4207_v24 = vld [vmem:[#allocation11 + $0x54] ss:$8 sps:$4 sm:$0xff]   ;;  %v4205_v25 = vld [vmem:[#allocation11 + $0x50] ss:$8 sps:$4 sm:$0xff]  }
 0x22b   : > { %2434 = vmatprep.subr.bf16.mxu1 %v4126_v26  ;;  %v4210_v26 = vld [vmem:[#allocation11 + $0x44] ss:$8 sps:$4 sm:$0xff]  }
 0x22d   : > { %2392 = vmatpush1.bf16.msra.mxu0 %v4121_v27  ;;  %v4208_v27 = vld [vmem:[#allocation11 + $0x40] ss:$8 sps:$4 sm:$0xff]  }
 0x22e   : > { %2435 = vmatpush1.bf16.msra.mxu1 %v4124_v30  ;;  %2393 = vmatprep.subr.bf16.mxu0 %v4129_v31  ;;  %v4213_v30 = vld [vmem:[#allocation11 + $0x34] ss:$8 sps:$4 sm:$0xff]   ;;  %v4211_v31 = vld [vmem:[#allocation11 + $0x30] ss:$8 sps:$4 sm:$0xff]  }
 0x22f   : > { %2436 = vmatprep.subr.bf16.mxu1 %v4132_v32  ;;  %v4216_v32 = vld [vmem:[#allocation11 + $0x24] ss:$8 sps:$4 sm:$0xff]  }
 0x231   : > { %2394 = vmatpush1.bf16.msra.mxu0 %v4127_v33  ;;  %v4249_v33 = vld [vmem:[#allocation11 + $0x174] ss:$8 sps:$4 sm:$0xff]  }
 0x232   : > { %2437 = vmatpush1.bf16.msra.mxu1 %v4130_v34  ;;  %2395 = vmatprep.subr.bf16.mxu0 %v4135_v35  ;;  %v4214_v34 = vld [vmem:[#allocation11 + $0x20] ss:$8 sps:$4 sm:$0xff]  }
 0x233   : > { %2438 = vmatprep.subr.bf16.mxu1 %v4138_v36  ;;  %v4250_v35 = vld [vmem:[#allocation11 + $0x160] ss:$8 sps:$4 sm:$0xff]   ;;  %v4219_v36 = vld [vmem:[#allocation11 + $0x14] ss:$8 sps:$4 sm:$0xff]  }
 0x235   : > { %2396 = vmatpush1.bf16.msra.mxu0 %v4133_v37  ;;  %v4255_v37 = vld [vmem:[#allocation11 + $0x154] ss:$8 sps:$4 sm:$0xff]  }
 0x236   : > { %2439 = vmatpush1.bf16.msra.mxu1 %v4136_v38  ;;  %2397 = vmatprep.subr.bf16.mxu0 %v4141_v39  ;;  %v4217_v38 = vld [vmem:[#allocation11 + $0x10] ss:$8 sps:$4 sm:$0xff]  }
 0x237   : > { %2440 = vmatprep.subr.bf16.mxu1 %v4144_v40  ;;  %v4253_v39 = vld [vmem:[#allocation11 + $0x150] ss:$8 sps:$4 sm:$0xff]   ;;  %v4222_v40 = vld [vmem:[#allocation11 + $0x4] ss:$8 sps:$4 sm:$0xff]  }
 0x239   : > { %2398 = vmatpush1.bf16.msra.mxu0 %v4139_v41  ;;  %v4258_v41 = vld [vmem:[#allocation11 + $0x144] ss:$8 sps:$4 sm:$0xff]  }
 0x23a   : > { %2441 = vmatpush1.bf16.msra.mxu1 %v4142_v42  ;;  %2399 = vmatprep.subr.bf16.mxu0 %v4147_v43  ;;  %v4220_v42 = vld [vmem:[#allocation11] ss:$8 sps:$4 sm:$0xff]  }
 0x23b   : > { %2442 = vmatprep.subr.bf16.mxu1 %v4150_v44  ;;  %v4256_v43 = vld [vmem:[#allocation11 + $0x140] ss:$8 sps:$4 sm:$0xff]   ;;  %v4225_v44 = vld [vmem:[#allocation11 + $0xf4] ss:$8 sps:$4 sm:$0xff]  }
 0x23d   : > { %2400 = vmatpush1.bf16.msra.mxu0 %v4145_v45  ;;  %v4261_v45 = vld [vmem:[#allocation11 + $0x134] ss:$8 sps:$4 sm:$0xff]  }
 0x23e   : > { %2443 = vmatpush1.bf16.msra.mxu1 %v4148_v46  ;;  %2401 = vmatprep.subr.bf16.mxu0 %v4153_v47  ;;  %v4223_v46 = vld [vmem:[#allocation11 + $0xf0] ss:$8 sps:$4 sm:$0xff]  }
 0x23f   : > { %2444 = vmatprep.subr.bf16.mxu1 %v4156_v48  ;;  %v4259_v47 = vld [vmem:[#allocation11 + $0x130] ss:$8 sps:$4 sm:$0xff]   ;;  %v4228_v48 = vld [vmem:[#allocation11 + $0xe4] ss:$8 sps:$4 sm:$0xff]  }
 0x241   : > { %2402 = vmatpush2.bf16.msra.mxu0 %v4151_v49  ;;  %v4264_v49 = vld [vmem:[#allocation11 + $0x124] ss:$8 sps:$4 sm:$0xff]  }
 0x242   : > { %2445 = vmatpush2.bf16.msra.mxu1 %v4154_v50  ;;  %2403 = vmatprep.subr.bf16.mxu0 %v4159_v51  ;;  %v4226_v50 = vld [vmem:[#allocation11 + $0xe0] ss:$8 sps:$4 sm:$0xff]  }
 0x243   : > { %2446 = vmatprep.subr.bf16.mxu1 %v4162_v52  ;;  %v4262_v51 = vld [vmem:[#allocation11 + $0x120] ss:$8 sps:$4 sm:$0xff]   ;;  %v4231_v52 = vld [vmem:[#allocation11 + $0xd4] ss:$8 sps:$4 sm:$0xff]  }
 0x245   : > { %2404 = vmatpush2.bf16.msra.mxu0 %v4157_v55  ;;  %v4267_v55 = vld [vmem:[#allocation11 + $0x114] ss:$8 sps:$4 sm:$0xff]  }
 0x246   : > { %2447 = vmatpush2.bf16.msra.mxu1 %v4160_v56  ;;  %2405 = vmatprep.subr.bf16.mxu0 %v4165_v57  ;;  %v4229_v56 = vld [vmem:[#allocation11 + $0xd0] ss:$8 sps:$4 sm:$0xff]  }
 0x247   : > { %2448 = vmatprep.subr.bf16.mxu1 %v4168_v58  ;;  %v4265_v57 = vld [vmem:[#allocation11 + $0x110] ss:$8 sps:$4 sm:$0xff]   ;;  %v4234_v58 = vld [vmem:[#allocation11 + $0xc4] ss:$8 sps:$4 sm:$0xff]  }
 0x249   : > { %2406 = vmatpush2.bf16.msra.mxu0 %v4163_v59  ;;  %v4270_v59 = vld [vmem:[#allocation11 + $0x104] ss:$8 sps:$4 sm:$0xff]  }
 0x24a   : > { %2449 = vmatpush2.bf16.msra.mxu1 %v4166_v60  ;;  %2407 = vmatprep.subr.bf16.mxu0 %v4171_v61  ;;  %v4232_v60 = vld [vmem:[#allocation11 + $0xc0] ss:$8 sps:$4 sm:$0xff]  }
 0x24b   : > { %2450 = vmatprep.subr.bf16.mxu1 %v4174_v62  ;;  %v4268_v61 = vld [vmem:[#allocation11 + $0x100] ss:$8 sps:$4 sm:$0xff]   ;;  %v4237_v62 = vld [vmem:[#allocation11 + $0xb4] ss:$8 sps:$4 sm:$0xff]  }
 0x24d   : > { %2408 = vmatpush2.bf16.msra.mxu0 %v4169_v63  ;;  %v4273_v63 = vld [vmem:[#allocation11 + $0x1f4] ss:$8 sps:$4 sm:$0xff]  }
 0x24e   : > { %2451 = vmatpush2.bf16.msra.mxu1 %v4172_v0  ;;  %2409 = vmatprep.subr.bf16.mxu0 %v4177_v1  ;;  %v4235_v0 = vld [vmem:[#allocation11 + $0xb0] ss:$8 sps:$4 sm:$0xff]  }
 0x24f   : > { %2452 = vmatprep.subr.bf16.mxu1 %v4180_v2  ;;  %v4271_v1 = vld [vmem:[#allocation11 + $0x1f0] ss:$8 sps:$4 sm:$0xff]   ;;  %v4240_v2 = vld [vmem:[#allocation11 + $0xa4] ss:$8 sps:$4 sm:$0xff]  }
 0x251   : > { %2410 = vmatpush2.bf16.msra.mxu0 %v4175_v3  ;;  %v4276_v3 = vld [vmem:[#allocation11 + $0x1e4] ss:$8 sps:$4 sm:$0xff]  }
 0x252   : > { %2453 = vmatpush2.bf16.msra.mxu1 %v4178_v4  ;;  %2411 = vmatprep.subr.bf16.mxu0 %v4183_v7  ;;  %v4238_v4 = vld [vmem:[#allocation11 + $0xa0] ss:$8 sps:$4 sm:$0xff]  }
 0x253   : > { %2454 = vmatprep.subr.bf16.mxu1 %v4186_v8  ;;  %v4274_v7 = vld [vmem:[#allocation11 + $0x1e0] ss:$8 sps:$4 sm:$0xff]   ;;  %v4243_v8 = vld [vmem:[#allocation11 + $0x94] ss:$8 sps:$4 sm:$0xff]  }
 0x255   : > { %2412 = vmatpush2.bf16.msra.mxu0 %v4181_v9  ;;  %v4279_v9 = vld [vmem:[#allocation11 + $0x1d4] ss:$8 sps:$4 sm:$0xff]  }
 0x256   : > { %2455 = vmatpush2.bf16.msra.mxu1 %v4184_v10  ;;  %2413 = vmatprep.subr.bf16.mxu0 %v4189_v11  ;;  %v4241_v10 = vld [vmem:[#allocation11 + $0x90] ss:$8 sps:$4 sm:$0xff]  }
 0x257   : > { %2456 = vmatprep.subr.bf16.mxu1 %v4192_v12  ;;  %v4277_v11 = vld [vmem:[#allocation11 + $0x1d0] ss:$8 sps:$4 sm:$0xff]   ;;  %v4246_v12 = vld [vmem:[#allocation11 + $0x84] ss:$8 sps:$4 sm:$0xff]  }
 0x259   : > { %2414 = vmatpush2.bf16.msra.mxu0 %v4187_v13  ;;  %v4282_v13 = vld [vmem:[#allocation11 + $0x1c4] ss:$8 sps:$4 sm:$0xff]  }
 0x25a   : > { %2457 = vmatpush2.bf16.msra.mxu1 %v4190_v16  ;;  %2415 = vmatprep.subr.bf16.mxu0 %v4195_v17  ;;  %v4244_v16 = vld [vmem:[#allocation11 + $0x80] ss:$8 sps:$4 sm:$0xff]  }
 0x25b   : > { %2458 = vmatprep.subr.bf16.mxu1 %v4198_v18  ;;  %v4280_v17 = vld [vmem:[#allocation11 + $0x1c0] ss:$8 sps:$4 sm:$0xff]   ;;  %v4285_v18 = vld [vmem:[#allocation11 + $0x1b4] ss:$8 sps:$4 sm:$0xff]  }
 0x25d   : > { %2416 = vmatpush2.bf16.msra.mxu0 %v4193_v19  ;;  %v4283_v19 = vld [vmem:[#allocation11 + $0x1b0] ss:$8 sps:$4 sm:$0xff]  }
 0x25e   : > { %2459 = vmatpush2.bf16.msra.mxu1 %v4196_v20  ;;  %2879 = vmatprep.subr.bf16.mxu0 %v4201_v21  ;;  %v4288_v20 = vld [vmem:[#allocation11 + $0x1a4] ss:$8 sps:$4 sm:$0xff]   ;;  %v4286_v21 = vld [vmem:[#allocation11 + $0x1a0] ss:$8 sps:$4 sm:$0xff]  }
 0x25f   : > { %2922 = vmatprep.subr.bf16.mxu1 %v4249_v33 }
 0x260   : > { %2418 = vmatmul.mubr.bf16.vlgmr.msra.gmra.mxu0 %v4971_v14  ;;  %v4247_v14 = vld [vmem:[#allocation11 + $0x170] ss:$8 sps:$4 sm:$0xff]  }
 0x261   : > { %2461 = vmatmul.mubr.bf16.vlgmr.msra.gmra.mxu1 %v4973_v15  ;;  %2880 = vmatpush1.bf16.msra.mxu0 %v4199_v22  ;;  %v4252_v15 = vld [vmem:[#allocation11 + $0x164] ss:$8 sps:$4 sm:$0xff]   ;;  %v4291_v22 = vld [vmem:[#allocation11 + $0x194] ss:$8 sps:$4 sm:$0xff]  }
 0x262   : > { %2881 = vmatprep.subr.bf16.mxu0 %v4204_v5  ;;  %2923 = vmatpush1.bf16.msra.mxu1 %v4247_v14  ;;  %v4289_v5 = vld [vmem:[#allocation11 + $0x190] ss:$8 sps:$4 sm:$0xff]  }
 0x263   : > { %2924 = vmatprep.subr.bf16.mxu1 %v4252_v15 }
 0x265   : > { %2882 = vmatpush1.bf16.msra.mxu0 %v4202_v6  ;;  %v4294_v6 = vld [vmem:[#allocation11 + $0x184] ss:$8 sps:$4 sm:$0xff]  }
 0x266   : > { %2883 = vmatprep.subr.bf16.mxu0 %v4207_v24  ;;  %2925 = vmatpush1.bf16.msra.mxu1 %v4250_v35  ;;  %v4292_v24 = vld [vmem:[#allocation11 + $0x180] ss:$8 sps:$4 sm:$0xff]  }
 0x267   : > { %2926 = vmatprep.subr.bf16.mxu1 %v4255_v37 }
 0x269   : > { %2884 = vmatpush1.bf16.msra.mxu0 %v4205_v25  ;;  %v1637_v25 = vld [vmem:[%s5032_s4] sm:$0xf] }
 0x26a   : > { %2885 = vmatprep.subr.bf16.mxu0 %v4210_v26  ;;  %2927 = vmatpush1.bf16.msra.mxu1 %v4253_v39  ;;  %v1646_v26 = vrot.slane %v1637_v25, %v4952_v28 }
 0x26b   : > { %2928 = vmatprep.subr.bf16.mxu1 %v4258_v41 }
 0x26d   : > { %2886 = vmatpush1.bf16.msra.mxu0 %v4208_v27  ;;  %v1642_v27 = vrot.slane %v1637_v25, %v4965_v53 }
 0x26e   : > { %2887 = vmatprep.subr.bf16.mxu0 %v4213_v30  ;;  %2929 = vmatpush1.bf16.msra.mxu1 %v4256_v43 }
 0x26f   : > { %2930 = vmatprep.subr.bf16.mxu1 %v4261_v45 }
 0x271   : > { %2888 = vmatpush1.bf16.msra.mxu0 %v4211_v31 }
 0x272   : > { %2889 = vmatprep.subr.bf16.mxu0 %v4216_v32  ;;  %2931 = vmatpush1.bf16.msra.mxu1 %v4259_v47 }
 0x273   : > { %2932 = vmatprep.subr.bf16.mxu1 %v4264_v49 }
 0x275   : > { %2890 = vmatpush1.bf16.msra.mxu0 %v4214_v34 }
 0x276   : > { %2891 = vmatprep.subr.bf16.mxu0 %v4219_v36  ;;  %2933 = vmatpush1.bf16.msra.mxu1 %v4262_v51  ;;  %v1650_v51 = vrot.slane %v1637_v25, %v1487_v54 }
 0x277   : > { %2934 = vmatprep.subr.bf16.mxu1 %v4267_v55 }
 0x279   : > { %2892 = vmatpush1.bf16.msra.mxu0 %v4217_v38 }
 0x27a   : > { %2893 = vmatprep.subr.bf16.mxu0 %v4222_v40  ;;  %2935 = vmatpush1.bf16.msra.mxu1 %v4265_v57 }
 0x27b   : > { %2936 = vmatprep.subr.bf16.mxu1 %v4270_v59 }
 0x27d   : > { %2894 = vmatpush1.bf16.msra.mxu0 %v4220_v42 }
 0x27e   : > { %2895 = vmatprep.subr.bf16.mxu0 %v4225_v44  ;;  %2937 = vmatpush1.bf16.msra.mxu1 %v4268_v61 }
 0x27f   : > { %2938 = vmatprep.subr.bf16.mxu1 %v4273_v63 }
 0x281   : > { %2896 = vmatpush2.bf16.msra.mxu0 %v4223_v46 }
 0x282   : > { %2897 = vmatprep.subr.bf16.mxu0 %v4228_v48  ;;  %2939 = vmatpush2.bf16.msra.mxu1 %v4271_v1 }
 0x283   : > { %2940 = vmatprep.subr.bf16.mxu1 %v4276_v3 }
 0x285   : > { %2898 = vmatpush2.bf16.msra.mxu0 %v4226_v50  ;;  %v1654_v50 = vrot.slane %v1637_v25, %v1491_v29  ;;  %v4308_v25 = vld [vmem:[#allocation12 + $0x8] sm:$0xff]  }
 0x286   : > { %2899 = vmatprep.subr.bf16.mxu0 %v4231_v52  ;;  %2941 = vmatpush2.bf16.msra.mxu1 %v4274_v7 }
 0x287   : > { %2942 = vmatprep.subr.bf16.mxu1 %v4279_v9 }
 0x289   : > { %2900 = vmatpush2.bf16.msra.mxu0 %v4229_v56 }
 0x28a   : > { %2901 = vmatprep.subr.bf16.mxu0 %v4234_v58  ;;  %2943 = vmatpush2.bf16.msra.mxu1 %v4277_v11  ;;  %v4295_v11 = vld [vmem:[#allocation12 + $0x78] sm:$0xff]  }
 0x28b   : > { %2944 = vmatprep.subr.bf16.mxu1 %v4282_v13  ;;  %v4297_v13 = vld [vmem:[#allocation12 + $0x70] sm:$0xff]  }
 0x28d   : > { %2902 = vmatpush2.bf16.msra.mxu0 %v4232_v60 }
 0x28e   : > { %2903 = vmatprep.subr.bf16.mxu0 %v4237_v62  ;;  %2945 = vmatpush2.bf16.msra.mxu1 %v4280_v17  ;;  %v4299_v17 = vld [vmem:[#allocation12 + $0x68] sm:$0xff]  }
 0x28f   : > { %2946 = vmatprep.subr.bf16.mxu1 %v4285_v18  ;;  %v4300_v18 = vld [vmem:[#allocation12 + $0x28] sm:$0xff]  }
 0x291   : > { %2904 = vmatpush2.bf16.msra.mxu0 %v4235_v0 }
 0x292   : > { %2905 = vmatprep.subr.bf16.mxu0 %v4240_v2  ;;  %2947 = vmatpush2.bf16.msra.mxu1 %v4283_v19  ;;  %v4301_v19 = vld [vmem:[#allocation12 + $0x60] sm:$0xff]  }
 0x293   : > { %2948 = vmatprep.subr.bf16.mxu1 %v4288_v20  ;;  %v4302_v20 = vld [vmem:[#allocation12 + $0x20] sm:$0xff]  }
 0x295   : > { %2906 = vmatpush2.bf16.msra.mxu0 %v4238_v4 }
 0x296   : > { %2907 = vmatprep.subr.bf16.mxu0 %v4243_v8  ;;  %2949 = vmatpush2.bf16.msra.mxu1 %v4286_v21  ;;  %v4303_v21 = vld [vmem:[#allocation12 + $0x58] sm:$0xff]  }
 0x297   : > { %2950 = vmatprep.subr.bf16.mxu1 %v4291_v22  ;;  %v4304_v22 = vld [vmem:[#allocation12 + $0x18] sm:$0xff]  }
 0x299   : > { %2908 = vmatpush2.bf16.msra.mxu0 %v4241_v10 }
 0x29a   : > { %2909 = vmatprep.subr.bf16.mxu0 %v4246_v12  ;;  %2951 = vmatpush2.bf16.msra.mxu1 %v4289_v5  ;;  %v4296_v12 = vld [vmem:[#allocation12 + $0x38] sm:$0xff]   ;;  %v4305_v5 = vld [vmem:[#allocation12 + $0x50] sm:$0xff]  }
 0x29b   : > { %2952 = vmatprep.subr.bf16.mxu1 %v4294_v6  ;;  %v4306_v6 = vld [vmem:[#allocation12 + $0x10] sm:$0xff]  }
 0x29d   : > { %2910 = vmatpush2.bf16.msra.mxu0 %v4244_v16  ;;  %v4298_v16 = vld [vmem:[#allocation12 + $0x30] sm:$0xff]  }
 0x29e   : > { %2953 = vmatpush2.bf16.msra.mxu1 %v4292_v24  ;;  %3669 = vmatprep.subr.bf16.mxu0 %v4295_v11  ;;  %v4307_v24 = vld [vmem:[#allocation12 + $0x48] sm:$0xff]  }
 0x2e0   : > { %v2333_v30 = vpop.f32.mrf.mxu0 }
 0x2e1   : > { %v2376_v31 = vpop.f32.mrf.mxu1  ;;  %v2334_v15 = vadd.f32 %v2333_v30, %v1642_v27 }
 0x2e2   : > { %v2335_v32 = vpop.f32.mrf.mxu0 }
 0x2e3   : > { %v2378_v33 = vpop.f32.mrf.mxu1  ;;  %v2336_v14 = vadd.f32 %v2335_v32, %v1646_v26  ;;  %v2377_v41 = vadd.f32 %v2376_v31, %v2334_v15  ;;  %v2547_v32 = vld [vmem:[%s5034_s6] sm:$0x3] }
 0x2e4   : > { %v2337_v34 = vpop.f32.mrf.mxu0  ;;  %v2552_v15 = vrot.slane %v2547_v32, %v4965_v53 }
 0x2e5   : > { %v2380_v35 = vpop.f32.mrf.mxu1  ;;  %v2338_v36 = vadd.f32 %v2337_v34, %v1642_v27  ;;  %v2379_v38 = vadd.f32 %v2378_v33, %v2336_v14  ;;  %v2471_v47 = vmax.f32 %v2377_v41, 0.0  ;;  %v4310_v27 = vld [vmem:[#allocation12] sm:$0xff]   ;;  %v2556_v14 = vrot.slane %v2547_v32, %v4952_v28 }
 0x2e6   : > { %v2339_v37 = vpop.f32.mrf.mxu0 }
 0x2e7   : > { %v2381_v39 = vadd.f32 %v2380_v35, %v2338_v36  ;;  %v2340_v40 = vadd.f32 %v2339_v37, %v1646_v26  ;;  %v2382_v42 = vpop.f32.mrf.mxu1  ;;  %v2472_v45 = vmax.f32 %v2379_v38, 0.0  ;;  %v4309_v26 = vld [vmem:[#allocation12 + $0x40] sm:$0xff]  }
 0x2e9   : > { %v2383_v43 = vadd.f32 %v2382_v42, %v2340_v40  ;;  %v2475_v44 = vmax.f32 %v2381_v39, 0.0 }
 0x2eb   : > { %v2476_v46 = vmax.f32 %v2383_v43, 0.0  ;;  %v2479_v49 = vpack.c.bf16 %v2475_v44, %v2471_v47 }
 0x2ed   : > { %v2480_v48 = vpack.c.bf16 %v2476_v46, %v2472_v45 }
 0x2ef   : > { %2911 = vmatprep.mubr.bf16.mxu0 %v2480_v48 }
 0x2f0   : > { %2912 = vmatmul.mubr.bf16.vlgmr.msra.gmra.mxu0 %v2479_v49 }
 0x2f1   : > { %3670 = vmatpush3.bf16.msra.mxu0 %v4296_v12 }
 0x2f2   : > { %3671 = vmatprep.subr.bf16.mxu0 %v4297_v13 }
 0x2f5   : > { %3672 = vmatpush3.bf16.msra.mxu0 %v4298_v16 }
 0x2f6   : > { %3673 = vmatprep.subr.bf16.mxu0 %v4299_v17 }
 0x2f9   : > { %3674 = vmatpush3.bf16.msra.mxu0 %v4300_v18 }
 0x2fa   : > { %3675 = vmatprep.subr.bf16.mxu0 %v4301_v19 }
 0x2fd   : > { %3676 = vmatpush3.bf16.msra.mxu0 %v4302_v20 }
 0x2fe   : > { %3677 = vmatprep.subr.bf16.mxu0 %v4303_v21 }
 0x301   : > { %3678 = vmatpush3.bf16.msra.mxu0 %v4304_v22 }
 0x302   : > { %3679 = vmatprep.subr.bf16.mxu0 %v4305_v5 }
 0x305   : > { %3680 = vmatpush3.bf16.msra.mxu0 %v4306_v6 }
 0x306   : > { %3681 = vmatprep.subr.bf16.mxu0 %v4307_v24 }
 0x309   : > { %3682 = vmatpush3.bf16.msra.mxu0 %v4308_v25 }
 0x30a   : > { %3683 = vmatprep.subr.bf16.mxu0 %v4309_v26 }
 0x30d   : > { %3684 = vmatpush3.bf16.msra.mxu0 %v4310_v27 }
 0x320   : > { %v2419_v52 = vpop.f32.mrf.mxu0 }
 0x321   : > { %v2462_v55 = vpop.f32.mrf.mxu1  ;;  %v2420_v59 = vadd.f32 %v2419_v52, %v1650_v51 }
 0x322   : > { %v2421_v56 = vpop.f32.mrf.mxu0 }
 0x323   : > { %v2464_v57 = vpop.f32.mrf.mxu1  ;;  %v2422_v58 = vadd.f32 %v2421_v56, %v1654_v50  ;;  %v2463_v3 = vadd.f32 %v2462_v55, %v2420_v59  ;;  %v3645_v55 = vld [vmem:[%s5036_s8] ss:$0 sm:$0xff] }
 0x324   : > { %v2423_v60 = vpop.f32.mrf.mxu0 }
 0x325   : > { %v2466_v61 = vpop.f32.mrf.mxu1  ;;  %v2424_v62 = vadd.f32 %v2423_v60, %v1650_v51  ;;  %v2465_v0 = vadd.f32 %v2464_v57, %v2422_v58  ;;  %v2473_v54 = vmax.f32 %v2463_v3, 0.0 }
 0x326   : > { %v2425_v63 = vpop.f32.mrf.mxu0 }
 0x327   : > { %v2467_v1 = vadd.f32 %v2466_v61, %v2424_v62  ;;  %v2426_v2 = vadd.f32 %v2425_v63, %v1654_v50  ;;  %v2468_v4 = vpop.f32.mrf.mxu1  ;;  %v2474_v8 = vmax.f32 %v2465_v0, 0.0 }
 0x329   : > { %v2469_v7 = vadd.f32 %v2468_v4, %v2426_v2  ;;  %v2477_v29 = vmax.f32 %v2467_v1, 0.0 }
 0x32b   : > { %v2478_v23 = vmax.f32 %v2469_v7, 0.0  ;;  %v2481_v10 = vpack.c.bf16 %v2477_v29, %v2473_v54 }
 0x32d   : > { %v2482_v9 = vpack.c.bf16 %v2478_v23, %v2474_v8 }
 0x32f   : > { %2954 = vmatprep.mubr.bf16.mxu1 %v2482_v9 }
 0x330   : > { %2955 = vmatmul.mubr.bf16.vlgmr.msra.gmra.mxu1 %v2481_v10 }
 0x3b0   : > { %v2913_v30 = vpop.f32.mrf.mxu0 }
 0x3b1   : > { %v2914_v39 = vadd.f32 %v2913_v30, %v2552_v15 }
 0x3b2   : > { %v2915_v31 = vpop.f32.mrf.mxu0 }
 0x3b3   : > { %v2916_v37 = vadd.f32 %v2915_v31, %v2556_v14 }
 0x3b4   : > { %v2917_v33 = vpop.f32.mrf.mxu0 }
 0x3b5   : > { %v2918_v38 = vadd.f32 %v2917_v33, %v2552_v15 }
 0x3b6   : > { %v2919_v35 = vpop.f32.mrf.mxu0 }
 0x3b7   : > { %v2920_v41 = vadd.f32 %v2919_v35, %v2556_v14 }
 0x3f0   : > { %v2956_v34 = vpop.f32.mrf.mxu1 }
 0x3f1   : > { %v2957_v44 = vadd.f32 %v2956_v34, %v2914_v39 }
 0x3f2   : > { %v2958_v36 = vpop.f32.mrf.mxu1 }
 0x3f3   : > { %v2959_v42 = vadd.f32 %v2958_v36, %v2916_v37  ;;  %v2965_v50 = vmax.f32 %v2957_v44, 0.0 }
 0x3f4   : > { %v2960_v40 = vpop.f32.mrf.mxu1 }
 0x3f5   : > { %v2961_v43 = vadd.f32 %v2960_v40, %v2918_v38  ;;  %v2966_v48 = vmax.f32 %v2959_v42, 0.0 }
 0x3f6   : > { %v2962_v45 = vpop.f32.mrf.mxu1 }
 0x3f7   : > { %v2963_v46 = vadd.f32 %v2962_v45, %v2920_v41  ;;  %v2967_v47 = vmax.f32 %v2961_v43, 0.0 }
 0x3f9   : > { %v2968_v49 = vmax.f32 %v2963_v46, 0.0  ;;  %v2969_v51 = vpack.c.bf16 %v2967_v47, %v2965_v50 }
 0x3fb   : > { %v2970_v28 = vpack.c.bf16 %v2968_v49, %v2966_v48 }
 0x3fd   : > { %3138 = vmatprep.mubr.bf16.mxu0 %v2970_v28 }
 0x3fe   : > { %3139 = vmatmul.mubr.bf16.vlgmr.msra.gmra.mxu0 %v2969_v51 }
 0x4be   : > { %v3685_v53 = vpop.f32.mrf.mxu0 }
 0x4c0   : > { %v3686_v52 = vpop.f32.mrf.mxu0 }
 0x4c1   : > { %v3687_v56 = vadd.f32 %v3686_v52, %v3685_v53 }
 0x4c2   : > { %v3688_v57 = vpop.f32.mrf.mxu0 }
 0x4c3   : > { %v3141_v58 = vadd.f32 %v3687_v56, %v3645_v55 }
 0x4c4   : > { %v3689_v59 = vpop.f32.mrf.mxu0 }
 0x4c5   : > { %v3690_v60 = vadd.f32 %v3689_v59, %v3688_v57  ;;  %v3147_v61 = vmul.f32 %v3141_v58, %v3141_v58 }
 0x4c7   : > { %v3144_v62 = vadd.f32 %v3690_v60, %v3645_v55  ;;  %3149 = vadd.xlane.f32.xlu0 %v3147_v61 }
 0x4c9   : > { %v3148_v63 = vmul.f32 %v3144_v62, %v3144_v62 }
 0x4cb   : > { %3151 = vadd.xlane.f32.xlu0 %v3148_v63 }
 0x550   : > { %v3150_v0 = vpop.xlane.xlu0 %3149 }
 0x551   : > { %v3153_v1 = vmax.f32 %v3150_v0, 1e-24 }
 0x553   : > { %4311 = vrsqrt.f32 %v3153_v1 }
 0x554   : > { %v3152_v2 = vpop.xlane.xlu0 %3151 }
 0x555   : > { %v3154_v3 = vmax.f32 %v3152_v2, 1e-24 }
 0x557   : > { %4313 = vrsqrt.f32 %v3154_v3 }
 0x560   : > { %v4312_v4 = vpop.eup %4311 }
 0x561   : > { %v3157_v7 = vmul.f32 %v4312_v4, %v3141_v58 }
 0x563   : > { %3159 = vst [vmem:[#allocation14] sm:$0xff] %v3157_v7 }
 0x564   : > { %v4314_v29 = vpop.eup %4313 }
 0x565   : > { %v3158_v8 = vmul.f32 %v4314_v29, %v3144_v62 }
 0x567   : > { %3160 = vst [vmem:[#allocation14 + $0x8] sm:$0xff] %v3158_v8 }
 0x568 PF: > { %p3744_p13 = scmp.eq.s32.totalorder %s4667_s15, 1  ;;  %s4585_s20 = smov [#allocation14]  }
 0x569   : > { %s3170_s22 = sshll.u32 %s4585_s20, 4  ;;  %s3171_s22 = int_to_ptr.vmem [resolvable:$true] %s3170_s22 }
 0x56a   : > { %s4475_s24 = scalar_lea.vmem %s3171_s22, 256  ;;  %p4482_p9 = scmp.lt.s32.totalorder %s3171_s22, %s3171_s22 }
 0x56b   : > { %p4476_p0 = scmp.ne.s32.totalorder %s3171_s22, %s4475_s24  ;;  %p4483_p2 = scmp.lt.s32.totalorder %s4475_s24, %s4475_s24 }
 0x56d   : > { %p4477_p3 = pnand %p4476_p0, %p3744_p13  ;;  %p4484_p7 = por %p4483_p2, %p4482_p9 }
 0x56f   : > { %p4478_p6 = pneg %p4477_p3 }
 0x571   : > { %p4485_p10 = pnand %p4484_p7, %p4478_p6 }
 0x573   : > { %4488 = shalt.err (!%p4485_p10)
}
 0x574   : > { %s4586_s23 = smov 128   ;;  %s4587_s21 = smov 8  }
 0x575   : > { %3712 = dma.vmem_to_hbm [thread:$0]  (%p3744_p13), %s3171_s22, 256, %s5037_s9, [#allocation5], %s4586_s23, %s4586_s23, %s4587_s21  }
 0x576   : > { %4544 = dma.done.wait (%p3744_p13), [#allocation5], 256  }
 0x577   : > { %4546 = vsyncadd (%p3744_p13), [#allocation5], 4294967040 }
 0x578 PF: > { %s5076_s19 = sld [smem:[#allocation22_spill]]  ;;  %s5080_s30 = smov %s4553_s10 }
 0x579   : > { %s5077_s29 = sld [smem:[#allocation21_spill]]  ;;  %s5082_s12 = smov %s4565_s13 }
 0x57a   : > { %s5078_s11 = sld [smem:[#allocation24_spill]] }
 0x57b   : > { %s5079_s2 = sld [smem:[#allocation23_spill]] }
 0x57e   : > { %s28_s14 = sadd.s32 1, %s5076_s19  }
 0x57f   : > { %p25_p11 = scmp.ge.s32.totalorder %s28_s14, 4   ;;  %s5081_s10 = smov %s5077_s29 }
 0x581   : > { %s5083_s13 = smov %s5079_s2  ;;  %27 = sbr.rel (!%p25_p11) target bundleno = 15 (0xf), region = 131 }
 0x586   :  { %3186 = vsyncpa [#allocation4], 1 }
 0x587   :  { %3188 = vsyncpa [#allocation4 + $0x1], 1 }
 0x588   :  { %3189 = vsyncpa [#allocation7], 1 }
 0x589   :  { %3191 = vsyncpa [#allocation7 + $0x1], 1 }
 0x58a   :  { %3192 = vsyncpa [#allocation10], 1 }
 0x58b   :  { %3193 = vsyncpa [#allocation13], 1 }
 0x58c   :  { %3194 = vsyncpa [#allocation5], 1 }
 0x58d   :  { %3196 = vsyncpa [#allocation5 + $0x1], 1 }

</bundles_post_ra>
